<compile_context>
chip_gen: v7x
topology: tpu7x:2x2x1
jax: 0.10.0
libtpu: 0.0.40
codegen_flags: <defaults>
</compile_context>

<pallas_src>
import jax
import jax.numpy as jnp
from jax.experimental import pallas as pl
from jax.experimental.pallas import tpu as pltpu


# --------------------------------------------------------------------------- #
# Kernel
# --------------------------------------------------------------------------- #
def _lstm_hetero_kernel(
    x_ref,        # (tile_n, F_in)   f32  raw node features
    h0_ref,       # (tile_n, H)      f32
    c0_ref,       # (tile_n, H)      f32
    w_x_ref,      # (F_in, 4H)       bf16 (encoder folded into LSTM W_ih)
    w_hh_ref,     # (H, 4H)          bf16
    b_gates_ref,  # (1, 4H)          f32  (b_enc@W_ih + b_ih + b_hh)
    w_d1_ref,     # (H, H)           bf16
    b_d1_ref,     # (1, H)           f32
    w_d2_ref,     # (H, out_f)       bf16
    b_d2_ref,     # (1, out_f)       f32
    d2_ref,       # (tile_n, out_f)  f32  decoder output
    hn_ref,       # (tile_n, H)      f32
    cn_ref,       # (tile_n, H)      f32
):
    H = h0_ref.shape[1]
    mm_dtype = w_x_ref.dtype  # bf16 (or f32 if caller opted out)

    h0 = h0_ref[...]
    c0 = c0_ref[...]

    # Fused encoder + LSTM input/hidden projections: two MXU passes,
    # f32 accumulation, no zero-weight padding rows.
    gates = jnp.dot(x_ref[...].astype(mm_dtype), w_x_ref[...],
                    preferred_element_type=jnp.float32)
    gates = gates + jnp.dot(h0.astype(mm_dtype), w_hh_ref[...],
                            preferred_element_type=jnp.float32)
    gates = gates + b_gates_ref[...]

    # PyTorch gate order: i, f, g, o.
    # NOTE: for H that is a multiple of 128 these slices are free vreg views;
    # at small H they lower to masked selects (acceptable, model-size bound).
    i_g = jax.nn.sigmoid(gates[:, 0 * H:1 * H])
    f_g = jax.nn.sigmoid(gates[:, 1 * H:2 * H])
    g_g = jnp.tanh(gates[:, 2 * H:3 * H])
    o_g = jax.nn.sigmoid(gates[:, 3 * H:4 * H])

    c_n = f_g * c0 + i_g * g_g        # f32 elementwise cell update
    h_n = o_g * jnp.tanh(c_n)

    hn_ref[...] = h_n.astype(hn_ref.dtype)
    cn_ref[...] = c_n.astype(cn_ref.dtype)

    # MLP decoder: Linear -> LeakyReLU(0.01) -> Linear
    d1 = jnp.dot(h_n.astype(mm_dtype), w_d1_ref[...],
                 preferred_element_type=jnp.float32) + b_d1_ref[...]
    d1 = jnp.where(d1 >= 0.0, d1, 0.01 * d1)
    d2 = jnp.dot(d1.astype(mm_dtype), w_d2_ref[...],
                 preferred_element_type=jnp.float32) + b_d2_ref[...]
    d2_ref[...] = d2.astype(d2_ref.dtype)


# --------------------------------------------------------------------------- #
# Tiling helpers
# --------------------------------------------------------------------------- #
def _round_up(x, m):
    return ((x + m - 1) // m) * m


def _pick_tile_n(n):
    """Pick a row-tile size; N is padded up to a multiple of it.

    - Tiny graphs (< 512 rows) are per-step-overhead bound: one grid step.
    - Larger graphs: at least 2 tiles so the 'parallel' grid axis can be
      sharded across v7x's 2 TensorCores; tiles are multiples of 256 rows,
      capped at 2048 rows so double-buffered streams stay far under VMEM.
    """
    if n < 512:
        return _round_up(max(n, 8), 8)
    return min(2048, _round_up(pl.cdiv(n, 2), 256))


# --------------------------------------------------------------------------- #
# Parameter prep (one-time weight folding; keep out of the per-call forward)
# --------------------------------------------------------------------------- #
def prepare_params(raw, matmul_dtype=jnp.bfloat16):
    """Fold the encoder into the LSTM input projection and cast matmul weights
    to `matmul_dtype` (bf16 by default: ~2x MXU throughput, half the weight
    DMA / VMEM footprint).  Biases stay f32."""
    w_x = (raw["w_enc"] @ raw["w_ih_t"]).astype(matmul_dtype)          # (F_in, 4H)
    b_gates = (raw["b_enc"] @ raw["w_ih_t"]
               + raw["b_ih"] + raw["b_hh"]).astype(jnp.float32)        # (1, 4H)
    return {
        "w_x": w_x,
        "w_hh": raw["w_hh_t"].astype(matmul_dtype),
        "b_gates": b_gates,
        "w_d1": raw["w_d1_t"].astype(matmul_dtype),
        "b_d1": raw["b_d1"].astype(jnp.float32),
        "w_d2": raw["w_d2_t"].astype(matmul_dtype),
        "b_d2": raw["b_d2"].astype(jnp.float32),
    }


# --------------------------------------------------------------------------- #
# Forward
# --------------------------------------------------------------------------- #
def lstm_hetero_gnn_forward(x, h_0, c_0, prep, *, tile_n=None):
    """x: (N, F_in) mesh node features.
       h_0, c_0: (1, N, H) PyTorch LSTM state layout.
       Returns (node_features (N, 1, out_f), h_n (1, N, H), c_n (1, N, H))."""
    N, F_in = x.shape
    H = prep["w_hh"].shape[0]
    out_f = prep["w_d2"].shape[1]

    x = x.astype(jnp.float32)
    h0 = h_0.reshape(N, H).astype(jnp.float32)
    c0 = c_0.reshape(N, H).astype(jnp.float32)

    if tile_n is None:
        tile_n = _pick_tile_n(N)
    n_pad = _round_up(N, tile_n)
    if n_pad != N:
        pad = n_pad - N
        x = jnp.pad(x, ((0, pad), (0, 0)))
        h0 = jnp.pad(h0, ((0, pad), (0, 0)))
        c0 = jnp.pad(c0, ((0, pad), (0, 0)))
    num_tiles = n_pad // tile_n

    weights = [prep["w_x"], prep["w_hh"], prep["b_gates"],
               prep["w_d1"], prep["b_d1"], prep["w_d2"], prep["b_d2"]]

    def node_spec(width):
        return pl.BlockSpec((tile_n, width), lambda i: (i, 0))

    def full_spec(arr):
        return pl.BlockSpec(arr.shape, lambda i: (0, 0))

    in_specs = ([node_spec(F_in), node_spec(H), node_spec(H)]
                + [full_spec(w) for w in weights])
    out_specs = (node_spec(out_f), node_spec(H), node_spec(H))
    out_shape = (jax.ShapeDtypeStruct((n_pad, out_f), jnp.float32),
                 jax.ShapeDtypeStruct((n_pad, H), jnp.float32),
                 jax.ShapeDtypeStruct((n_pad, H), jnp.float32))

    # Explicit VMEM budget: double-buffered per-tile streams + weight blocks,
    # with headroom, capped at 64 MiB so scaled-up configs still fit v7x.
    row_bytes = 4 * (F_in + 2 * H) + 4 * (out_f + 2 * H)
    weight_bytes = sum(w.size * w.dtype.itemsize for w in weights)
    vmem_estimate = 2 * tile_n * row_bytes + 2 * weight_bytes + (2 << 20)
    vmem_limit = int(min(max(vmem_estimate, 32 << 20), 64 << 20))

    d2, h_n, c_n = pl.pallas_call(
        _lstm_hetero_kernel,
        grid=(num_tiles,),
        in_specs=in_specs,
        out_specs=out_specs,
        out_shape=out_shape,
        compiler_params=pltpu.CompilerParams(
            # 1-step grids stay "arbitrary" (don't ask v7x to split trivial
            # work across its 2 TCs); multi-step grids are "parallel".
            dimension_semantics=("arbitrary",) if num_tiles == 1 else ("parallel",),
            vmem_limit_bytes=vmem_limit,
        ),
    )(x, h0, c0, *weights)

    if n_pad != N:
        d2, h_n, c_n = d2[:N], h_n[:N], c_n[:N]

    # Match PyTorch output shapes: decoder output keeps the seq dim (N, 1, out_f),
    # states are (num_layers=1, N, H).  These reshapes are free.
    return d2.reshape(N, 1, out_f), h_n.reshape(1, N, H), c_n.reshape(1, N, H)


# --------------------------------------------------------------------------- #
# Reference implementations & init
# --------------------------------------------------------------------------- #
def init_params(key, f_in, latent, out_f):
    ks = jax.random.split(key, 10)
    s = 0.1

    def rnd(k, shape):
        return (s * jax.random.normal(k, shape)).astype(jnp.float32)

    return {
        # encoder (stand-in for HeteroGNNBase 'mesh' node latent)
        "w_enc": rnd(ks[0], (f_in, latent)),
        "b_enc": rnd(ks[1], (1, latent)),
        # LSTM weights (stored pre-transposed: x @ W_ih^T == x @ w_ih_t)
        "w_ih_t": rnd(ks[2], (latent, 4 * latent)),
        "b_ih":   rnd(ks[3], (1, 4 * latent)),
        "w_hh_t": rnd(ks[4], (latent, 4 * latent)),
        "b_hh":   rnd(ks[5], (1, 4 * latent)),
        # MLP decoder
        "w_d1_t": rnd(ks[6], (latent, latent)),
        "b_d1":   rnd(ks[7], (1, latent)),
        "w_d2_t": rnd(ks[8], (latent, out_f)),
        "b_d2":   rnd(ks[9], (1, out_f)),
    }


def reference_forward_f32(x, h_0, c_0, p):
    """Full-f32, unfolded reference (mirrors the PyTorch module math)."""
    N = x.shape[0]
    H = p["w_hh_t"].shape[0]
    z = x @ p["w_enc"] + p["b_enc"]
    h0 = h_0.reshape(N, H)
    c0 = c_0.reshape(N, H)
    gates = z @ p["w_ih_t"] + p["b_ih"] + h0 @ p["w_hh_t"] + p["b_hh"]
    i = jax.nn.sigmoid(gates[:, :H])
    f = jax.nn.sigmoid(gates[:, H:2 * H])
    g = jnp.tanh(gates[:, 2 * H:3 * H])
    o = jax.nn.sigmoid(gates[:, 3 * H:4 * H])
    c_n = f * c0 + i * g
    h_n = o * jnp.tanh(c_n)
    d1 = h_n @ p["w_d1_t"] + p["b_d1"]
    d1 = jnp.where(d1 >= 0, d1, 0.01 * d1)
    d2 = d1 @ p["w_d2_t"] + p["b_d2"]
    return d2.reshape(N, 1, -1), h_n.reshape(1, N, H), c_n.reshape(1, N, H)


def reference_forward_prepped(x, h_0, c_0, p):
    """Mirrors the kernel's math exactly (folded weights, bf16 matmul operands,
    f32 accumulation + f32 elementwise) -> tight kernel-correctness check."""
    N = x.shape[0]
    H = p["w_hh"].shape[0]
    mm = p["w_x"].dtype
    h0 = h_0.reshape(N, H).astype(jnp.float32)
    c0 = c_0.reshape(N, H).astype(jnp.float32)
    gates = (jnp.dot(x.astype(mm), p["w_x"], preferred_element_type=jnp.float32)
             + jnp.dot(h0.astype(mm), p["w_hh"], preferred_element_type=jnp.float32)
             + p["b_gates"])
    i = jax.nn.sigmoid(gates[:, :H])
    f = jax.nn.sigmoid(gates[:, H:2 * H])
    g = jnp.tanh(gates[:, 2 * H:3 * H])
    o = jax.nn.sigmoid(gates[:, 3 * H:4 * H])
    c_n = f * c0 + i * g
    h_n = o * jnp.tanh(c_n)
    d1 = jnp.dot(h_n.astype(mm), p["w_d1"],
                 preferred_element_type=jnp.float32) + p["b_d1"]
    d1 = jnp.where(d1 >= 0, d1, 0.01 * d1)
    d2 = jnp.dot(d1.astype(mm), p["w_d2"],
                 preferred_element_type=jnp.float32) + p["b_d2"]
    return d2.reshape(N, 1, -1), h_n.reshape(1, N, H), c_n.reshape(1, N, H)


# --------------------------------------------------------------------------- #
# Demo
# --------------------------------------------------------------------------- #
if __name__ == "__main__":
    N, F_IN, LATENT, OUT_F = 128, 4, 32, 2

    key = jax.random.PRNGKey(0)
    kx, kh, kc, kp = jax.random.split(key, 4)

    x = jax.random.normal(kx, (N, F_IN), dtype=jnp.float32)
    h_0 = jax.random.normal(kh, (1, N, LATENT), dtype=jnp.float32)
    c_0 = jax.random.normal(kc, (1, N, LATENT), dtype=jnp.float32)

    raw_params = init_params(kp, F_IN, LATENT, OUT_F)
    prep = prepare_params(raw_params, matmul_dtype=jnp.bfloat16)  # one-time fold

    fwd = jax.jit(lambda xx, hh, cc: lstm_hetero_gnn_forward(xx, hh, cc, prep))
    node_out, h_n, c_n = fwd(x, h_0, c_0)
    jax.block_until_ready((node_out, h_n, c_n))

    # Tight check: kernel vs XLA doing the identical (folded, bf16-operand,
    # f32-accumulate) math.
    ref_out, ref_h, ref_c = reference_forward_prepped(x, h_0, c_0, prep)
    assert jnp.allclose(node_out, ref_out, atol=1e-3, rtol=1e-3)
    assert jnp.allclose(h_n, ref_h, atol=1e-3, rtol=1e-3)
    assert jnp.allclose(c_n, ref_c, atol=1e-3, rtol=1e-3)

    # Loose check vs the full-f32 unfolded reference: bounds the bf16 matmul
    # operand quantization introduced for MXU throughput.
    f32_out, f32_h, f32_c = reference_forward_f32(x, h_0, c_0, raw_params)
    assert jnp.allclose(node_out, f32_out, atol=5e-2, rtol=5e-2)
    assert jnp.allclose(h_n, f32_h, atol=5e-2, rtol=5e-2)
    assert jnp.allclose(c_n, f32_c, atol=5e-2, rtol=5e-2)

    print("KERNEL_OK")
</pallas_src>

<mosaic_0001>
module attributes {stable_mosaic.version = 11 : i64} {
  func.func @_lstm_hetero_kernel(%arg0: i32, %arg1: memref<128x4xf32, #tpu.memory_space<vmem>>, %arg2: memref<128x32xf32, #tpu.memory_space<vmem>>, %arg3: memref<128x32xf32, #tpu.memory_space<vmem>>, %arg4: memref<4x128xbf16, #tpu.memory_space<vmem>>, %arg5: memref<32x128xbf16, #tpu.memory_space<vmem>>, %arg6: memref<1x128xf32, #tpu.memory_space<vmem>>, %arg7: memref<32x32xbf16, #tpu.memory_space<vmem>>, %arg8: memref<1x32xf32, #tpu.memory_space<vmem>>, %arg9: memref<32x2xbf16, #tpu.memory_space<vmem>>, %arg10: memref<1x2xf32, #tpu.memory_space<vmem>>, %arg11: memref<128x2xf32, #tpu.memory_space<vmem>>, %arg12: memref<128x32xf32, #tpu.memory_space<vmem>>, %arg13: memref<128x32xf32, #tpu.memory_space<vmem>>) attributes {dimension_semantics = [#tpu.dimension_semantics<arbitrary>], iteration_bounds = array<i64: 1>, scalar_prefetch = 0 : i64, scratch_operands = 0 : i64, tpu.core_type = #tpu.core_type<tc>, window_params = [{transform_indices = @transform_0, window_bounds = array<i64: 128, 4>}, {transform_indices = @transform_1, window_bounds = array<i64: 128, 32>}, {transform_indices = @transform_2, window_bounds = array<i64: 128, 32>}, {pipeline_mode = #tpu.pipeline_mode<synchronous>, transform_indices = @transform_3, window_bounds = array<i64: 4, 128>}, {pipeline_mode = #tpu.pipeline_mode<synchronous>, transform_indices = @transform_4, window_bounds = array<i64: 32, 128>}, {pipeline_mode = #tpu.pipeline_mode<synchronous>, transform_indices = @transform_5, window_bounds = array<i64: 1, 128>}, {pipeline_mode = #tpu.pipeline_mode<synchronous>, transform_indices = @transform_6, window_bounds = array<i64: 32, 32>}, {pipeline_mode = #tpu.pipeline_mode<synchronous>, transform_indices = @transform_7, window_bounds = array<i64: 1, 32>}, {pipeline_mode = #tpu.pipeline_mode<synchronous>, transform_indices = @transform_8, window_bounds = array<i64: 32, 2>}, {pipeline_mode = #tpu.pipeline_mode<synchronous>, transform_indices = @transform_9, window_bounds = array<i64: 1, 2>}, {transform_indices = @transform_10, window_bounds = array<i64: 128, 2>}, {transform_indices = @transform_11, window_bounds = array<i64: 128, 32>}, {transform_indices = @transform_12, window_bounds = array<i64: 128, 32>}]} {
    %c0 = arith.constant 0 : index
    %c0_0 = arith.constant 0 : index
    %0 = vector.load %arg2[%c0, %c0_0] : memref<128x32xf32, #tpu.memory_space<vmem>>, vector<128x32xf32>
    %c0_1 = arith.constant 0 : index
    %c0_2 = arith.constant 0 : index
    %1 = vector.load %arg3[%c0_1, %c0_2] : memref<128x32xf32, #tpu.memory_space<vmem>>, vector<128x32xf32>
    %c0_3 = arith.constant 0 : index
    %c0_4 = arith.constant 0 : index
    %2 = vector.load %arg1[%c0_3, %c0_4] : memref<128x4xf32, #tpu.memory_space<vmem>>, vector<128x4xf32>
    %3 = arith.truncf %2 : vector<128x4xf32> to vector<128x4xbf16>
    %c0_5 = arith.constant 0 : index
    %c0_6 = arith.constant 0 : index
    %4 = vector.load %arg4[%c0_5, %c0_6] : memref<4x128xbf16, #tpu.memory_space<vmem>>, vector<4x128xbf16>
    %cst = arith.constant dense<0.000000e+00> : vector<128x128xf32>
    %5 = tpu.matmul %3, %4, %cst {dimension_numbers = #tpu.dot_dimension_numbers<[1], [0], [0], [1], [0, 0, 1, 1], [], []>} : vector<128x4xbf16>, vector<4x128xbf16>, vector<128x128xf32> -> vector<128x128xf32>
    %6 = arith.truncf %0 : vector<128x32xf32> to vector<128x32xbf16>
    %c0_7 = arith.constant 0 : index
    %c0_8 = arith.constant 0 : index
    %7 = vector.load %arg5[%c0_7, %c0_8] : memref<32x128xbf16, #tpu.memory_space<vmem>>, vector<32x128xbf16>
    %cst_9 = arith.constant dense<0.000000e+00> : vector<128x128xf32>
    %8 = tpu.matmul %6, %7, %cst_9 {dimension_numbers = #tpu.dot_dimension_numbers<[1], [0], [0], [1], [0, 0, 1, 1], [], []>} : vector<128x32xbf16>, vector<32x128xbf16>, vector<128x128xf32> -> vector<128x128xf32>
    %9 = arith.addf %5, %8 : vector<128x128xf32>
    %c0_10 = arith.constant 0 : index
    %c0_11 = arith.constant 0 : index
    %10 = vector.load %arg6[%c0_10, %c0_11] : memref<1x128xf32, #tpu.memory_space<vmem>>, vector<1x128xf32>
    %11 = vector.broadcast %10 : vector<1x128xf32> to vector<128x128xf32>
    %12 = arith.addf %9, %11 : vector<128x128xf32>
    %13 = vector.extract_strided_slice %12 {offsets = [0, 0], sizes = [128, 32], strides = [1, 1]} : vector<128x128xf32> to vector<128x32xf32>
    %14 = arith.negf %13 : vector<128x32xf32>
    %15 = math.exp %14 : vector<128x32xf32>
    %cst_12 = arith.constant 1.000000e+00 : f32
    %16 = vector.broadcast %cst_12 : f32 to vector<128x32xf32>
    %17 = arith.addf %16, %15 : vector<128x32xf32>
    %18 = arith.divf %16, %17 : vector<128x32xf32>
    %19 = vector.extract_strided_slice %12 {offsets = [0, 32], sizes = [128, 32], strides = [1, 1]} : vector<128x128xf32> to vector<128x32xf32>
    %20 = arith.negf %19 : vector<128x32xf32>
    %21 = math.exp %20 : vector<128x32xf32>
    %cst_13 = arith.constant 1.000000e+00 : f32
    %22 = vector.broadcast %cst_13 : f32 to vector<128x32xf32>
    %23 = arith.addf %22, %21 : vector<128x32xf32>
    %24 = arith.divf %22, %23 : vector<128x32xf32>
    %25 = vector.extract_strided_slice %12 {offsets = [0, 64], sizes = [128, 32], strides = [1, 1]} : vector<128x128xf32> to vector<128x32xf32>
    %26 = math.tanh %25 : vector<128x32xf32>
    %27 = vector.extract_strided_slice %12 {offsets = [0, 96], sizes = [128, 32], strides = [1, 1]} : vector<128x128xf32> to vector<128x32xf32>
    %28 = arith.negf %27 : vector<128x32xf32>
    %29 = math.exp %28 : vector<128x32xf32>
    %cst_14 = arith.constant 1.000000e+00 : f32
    %30 = vector.broadcast %cst_14 : f32 to vector<128x32xf32>
    %31 = arith.addf %30, %29 : vector<128x32xf32>
    %32 = arith.divf %30, %31 : vector<128x32xf32>
    %33 = arith.mulf %24, %1 : vector<128x32xf32>
    %34 = arith.mulf %18, %26 : vector<128x32xf32>
    %35 = arith.addf %33, %34 : vector<128x32xf32>
    %36 = math.tanh %35 : vector<128x32xf32>
    %37 = arith.mulf %32, %36 : vector<128x32xf32>
    %c0_15 = arith.constant 0 : index
    %c0_16 = arith.constant 0 : index
    %38 = vector.load %arg12[%c0_15, %c0_16] : memref<128x32xf32, #tpu.memory_space<vmem>>, vector<128x32xf32>
    tpu.vector_store %arg12[%c0_15, %c0_16], %37 {strides = array<i32>} : memref<128x32xf32, #tpu.memory_space<vmem>>, vector<128x32xf32>,
    %c0_17 = arith.constant 0 : index
    %c0_18 = arith.constant 0 : index
    %39 = vector.load %arg13[%c0_17, %c0_18] : memref<128x32xf32, #tpu.memory_space<vmem>>, vector<128x32xf32>
    tpu.vector_store %arg13[%c0_17, %c0_18], %35 {strides = array<i32>} : memref<128x32xf32, #tpu.memory_space<vmem>>, vector<128x32xf32>,
    %40 = arith.truncf %37 : vector<128x32xf32> to vector<128x32xbf16>
    %c0_19 = arith.constant 0 : index
    %c0_20 = arith.constant 0 : index
    %41 = vector.load %arg7[%c0_19, %c0_20] : memref<32x32xbf16, #tpu.memory_space<vmem>>, vector<32x32xbf16>
    %cst_21 = arith.constant dense<0.000000e+00> : vector<128x32xf32>
    %42 = tpu.matmul %40, %41, %cst_21 {dimension_numbers = #tpu.dot_dimension_numbers<[1], [0], [0], [1], [0, 0, 1, 1], [], []>} : vector<128x32xbf16>, vector<32x32xbf16>, vector<128x32xf32> -> vector<128x32xf32>
    %c0_22 = arith.constant 0 : index
    %c0_23 = arith.constant 0 : index
    %43 = vector.load %arg8[%c0_22, %c0_23] : memref<1x32xf32, #tpu.memory_space<vmem>>, vector<1x32xf32>
    %44 = vector.broadcast %43 : vector<1x32xf32> to vector<128x32xf32>
    %45 = arith.addf %42, %44 : vector<128x32xf32>
    %cst_24 = arith.constant 0.000000e+00 : f32
    %46 = vector.broadcast %cst_24 : f32 to vector<128x32xf32>
    %47 = arith.cmpf oge, %45, %46 : vector<128x32xf32>
    %cst_25 = arith.constant 0.00999999977 : f32
    %48 = vector.broadcast %cst_25 : f32 to vector<128x32xf32>
    %49 = arith.mulf %48, %45 : vector<128x32xf32>
    %50 = arith.select %47, %45, %49 : vector<128x32xi1>, vector<128x32xf32>
    %51 = arith.truncf %50 : vector<128x32xf32> to vector<128x32xbf16>
    %c0_26 = arith.constant 0 : index
    %c0_27 = arith.constant 0 : index
    %52 = vector.load %arg9[%c0_26, %c0_27] : memref<32x2xbf16, #tpu.memory_space<vmem>>, vector<32x2xbf16>
    %cst_28 = arith.constant dense<0.000000e+00> : vector<128x2xf32>
    %53 = tpu.matmul %51, %52, %cst_28 {dimension_numbers = #tpu.dot_dimension_numbers<[1], [0], [0], [1], [0, 0, 1, 1], [], []>} : vector<128x32xbf16>, vector<32x2xbf16>, vector<128x2xf32> -> vector<128x2xf32>
    %c0_29 = arith.constant 0 : index
    %c0_30 = arith.constant 0 : index
    %54 = vector.load %arg10[%c0_29, %c0_30] : memref<1x2xf32, #tpu.memory_space<vmem>>, vector<1x2xf32>
    %55 = vector.broadcast %54 : vector<1x2xf32> to vector<128x2xf32>
    %56 = arith.addf %53, %55 : vector<128x2xf32>
    %c0_31 = arith.constant 0 : index
    %c0_32 = arith.constant 0 : index
    %57 = vector.load %arg11[%c0_31, %c0_32] : memref<128x2xf32, #tpu.memory_space<vmem>>, vector<128x2xf32>
    tpu.vector_store %arg11[%c0_31, %c0_32], %56 {strides = array<i32>} : memref<128x2xf32, #tpu.memory_space<vmem>>, vector<128x2xf32>,
    return
  }
  func.func @transform_0(%arg0: i32) -> (i32, i32) {
    %c0_i32 = arith.constant 0 : i32
    %c0_i32_0 = arith.constant 0 : i32
    return %arg0, %c0_i32 : i32, i32
  }
  func.func @transform_1(%arg0: i32) -> (i32, i32) {
    %c0_i32 = arith.constant 0 : i32
    %c0_i32_0 = arith.constant 0 : i32
    return %arg0, %c0_i32 : i32, i32
  }
  func.func @transform_2(%arg0: i32) -> (i32, i32) {
    %c0_i32 = arith.constant 0 : i32
    %c0_i32_0 = arith.constant 0 : i32
    return %arg0, %c0_i32 : i32, i32
  }
  func.func @transform_3(%arg0: i32) -> (i32, i32) {
    %c0_i32 = arith.constant 0 : i32
    %c0_i32_0 = arith.constant 0 : i32
    %c0_i32_1 = arith.constant 0 : i32
    return %c0_i32, %c0_i32_0 : i32, i32
  }
  func.func @transform_4(%arg0: i32) -> (i32, i32) {
    %c0_i32 = arith.constant 0 : i32
    %c0_i32_0 = arith.constant 0 : i32
    %c0_i32_1 = arith.constant 0 : i32
    return %c0_i32, %c0_i32_0 : i32, i32
  }
  func.func @transform_5(%arg0: i32) -> (i32, i32) {
    %c0_i32 = arith.constant 0 : i32
    %c0_i32_0 = arith.constant 0 : i32
    %c0_i32_1 = arith.constant 0 : i32
    return %c0_i32, %c0_i32_0 : i32, i32
  }
  func.func @transform_6(%arg0: i32) -> (i32, i32) {
    %c0_i32 = arith.constant 0 : i32
    %c0_i32_0 = arith.constant 0 : i32
    %c0_i32_1 = arith.constant 0 : i32
    return %c0_i32, %c0_i32_0 : i32, i32
  }
  func.func @transform_7(%arg0: i32) -> (i32, i32) {
    %c0_i32 = arith.constant 0 : i32
    %c0_i32_0 = arith.constant 0 : i32
    %c0_i32_1 = arith.constant 0 : i32
    return %c0_i32, %c0_i32_0 : i32, i32
  }
  func.func @transform_8(%arg0: i32) -> (i32, i32) {
    %c0_i32 = arith.constant 0 : i32
    %c0_i32_0 = arith.constant 0 : i32
    %c0_i32_1 = arith.constant 0 : i32
    return %c0_i32, %c0_i32_0 : i32, i32
  }
  func.func @transform_9(%arg0: i32) -> (i32, i32) {
    %c0_i32 = arith.constant 0 : i32
    %c0_i32_0 = arith.constant 0 : i32
    %c0_i32_1 = arith.constant 0 : i32
    return %c0_i32, %c0_i32_0 : i32, i32
  }
  func.func @transform_10(%arg0: i32) -> (i32, i32) {
    %c0_i32 = arith.constant 0 : i32
    %c0_i32_0 = arith.constant 0 : i32
    return %arg0, %c0_i32 : i32, i32
  }
  func.func @transform_11(%arg0: i32) -> (i32, i32) {
    %c0_i32 = arith.constant 0 : i32
    %c0_i32_0 = arith.constant 0 : i32
    return %arg0, %c0_i32 : i32, i32
  }
  func.func @transform_12(%arg0: i32) -> (i32, i32) {
    %c0_i32 = arith.constant 0 : i32
    %c0_i32_0 = arith.constant 0 : i32
    return %arg0, %c0_i32 : i32, i32
  }
}

</mosaic_0001>

<bundles_post_ra>
// kernel: _lambda_.1
= control target key start
LH: loop header
LB: loop body
LE: loop exit
PB: predicated region body
PF: predicated region fallthrough
CT: control target
= control target key end

     0   :  { %vm120_vm0 = vcmask 261120   ;;  %vm267_vm1 = vcmask 1041408   ;;  %vm242_vm2 = vcmask 31744   ;;  %s1733_s14 = smov 32   ;;  %s2536_s4 = inlined_call_operand.vmem [shape: bf16[32,128], index: 4, kind: input, shape index: {}]   ;;  %s2537_s1 = inlined_call_operand.vmem [shape: f32[128,32], index: 1, kind: input, shape index: {}]   ;;  %s2538_s3 = inlined_call_operand.vmem [shape: bf16[4,128], index: 3, kind: input, shape index: {}]   ;;  %s2539_s0 = inlined_call_operand.vmem [shape: f32[128,4], index: 0, kind: input, shape index: {}]   ;;  %s2540_s5 = inlined_call_operand.vmem [shape: f32[1,128], index: 5, kind: input, shape index: {}]   ;;  %s2541_s2 = inlined_call_operand.vmem [shape: f32[128,32], index: 2, kind: input, shape index: {}]   ;;  %s2542_s6 = inlined_call_operand.vmem [shape: bf16[32,32], index: 6, kind: input, shape index: {}]   ;;  %s2543_s8 = inlined_call_operand.vmem [shape: bf16[32,2], index: 8, kind: input, shape index: {}]   ;;  %s2544_s11 = inlined_call_operand.vmem [shape: f32[128,32], index: 11, kind: output, shape index: {1}]   ;;  %s2545_s12 = inlined_call_operand.vmem [shape: f32[128,32], index: 12, kind: output, shape index: {2}]   ;;  %s2546_s7 = inlined_call_operand.vmem [shape: f32[1,32], index: 7, kind: input, shape index: {}]   ;;  %s2547_s9 = inlined_call_operand.vmem [shape: f32[1,2], index: 9, kind: input, shape index: {}]   ;;  %s2548_s10 = inlined_call_operand.vmem [shape: f32[128,2], index: 10, kind: output, shape index: {0}]  }
   0x1   :  { %v1598_v0 = vld [vmem:[%s2536_s4] sm:$0xff]   ;;  %v1599_v1 = vld [vmem:[%s2536_s4 + $0x8] sm:$0xff]   ;;  %v41_v5 = vld [vmem:[%s2537_s1 + $0x10] sm:$0xff] }
   0x2   :  { %1500 = vmatprep.subr.bf16.mxu0 %v1598_v0  ;;  %v39_v2 = vld [vmem:[%s2537_s1] sm:$0xff]  ;;  %v40_v3 = vld [vmem:[%s2537_s1 + $0x8] sm:$0xff]  ;;  %v42_v6 = vld [vmem:[%s2537_s1 + $0x18] sm:$0xff] }
   0x3   :  { %1501 = vmatpush3.bf16.msra.mxu0 %v1598_v0  ;;  %v96_v4 = vpack.c.bf16 %v40_v3, %v39_v2  ;;  %v43_v7 = vld [vmem:[%s2537_s1 + $0x20] sm:$0xff]  ;;  %v44_v8 = vld [vmem:[%s2537_s1 + $0x28] sm:$0xff]  ;;  %v97_v10 = vpack.c.bf16 %v42_v6, %v41_v5  ;;  %v45_v13 = vld [vmem:[%s2537_s1 + $0x30] sm:$0xff] }
   0x4   :  { %1502 = vmatprep.subr.bf16.mxu0 %v1599_v1  ;;  %v95_v9 = vld [vmem:[%s2538_s3] sm:$0x3]  ;;  %v98_v11 = vpack.c.bf16 %v44_v8, %v43_v7  ;;  %v46_v14 = vld [vmem:[%s2537_s1 + $0x38] sm:$0xff]  ;;  %v48_v16 = vld [vmem:[%s2537_s1 + $0x48] sm:$0xff] }
   0x5   :  { %1504 = vmatprep.mubr.msk.bf16.mxu0 %vm120_vm0, %v96_v4  ;;  %v269_v12 = vsel %vm267_vm1, %v95_v9, 0  ;;  %v47_v15 = vld [vmem:[%s2537_s1 + $0x40] sm:$0xff]  ;;  %v99_v17 = vpack.c.bf16 %v46_v14, %v45_v13  ;;  %v49_v19 = vld [vmem:[%s2537_s1 + $0x50] sm:$0xff]  ;;  %v50_v20 = vld [vmem:[%s2537_s1 + $0x58] sm:$0xff] }
   0x6   :  { %v100_v18 = vpack.c.bf16 %v48_v16, %v47_v15  ;;  %v51_v21 = vld [vmem:[%s2537_s1 + $0x60] sm:$0xff]  ;;  %v52_v22 = vld [vmem:[%s2537_s1 + $0x68] sm:$0xff]  ;;  %v101_v23 = vpack.c.bf16 %v50_v20, %v49_v19  ;;  %v53_v25 = vld [vmem:[%s2537_s1 + $0x70] sm:$0xff] }
   0x7   :  { %1503 = vmatpush3.bf16.msra.mxu0 %v1599_v1  ;;  %v102_v24 = vpack.c.bf16 %v52_v22, %v51_v21  ;;  %v54_v26 = vld [vmem:[%s2537_s1 + $0x78] sm:$0xff]  ;;  %v71_v27 = vld [vmem:[%s2539_s0] sm:$0xff]  ;;  %v72_v28 = vld [vmem:[%s2539_s0 + $0x8] sm:$0xff] }
   0x8   :  { %1594 = vmatprep.subr.msk.bf16.mxu0 %vm267_vm1, %v95_v9  ;;  %v103_v29 = vpack.c.bf16 %v54_v26, %v53_v25  ;;  %v87_v30 = vpack.c.bf16 %v72_v28, %v71_v27  ;;  %v73_v31 = vld [vmem:[%s2539_s0 + $0x10] sm:$0xff]  ;;  %v74_v32 = vld [vmem:[%s2539_s0 + $0x18] sm:$0xff]  ;;  %v75_v33 = vld [vmem:[%s2539_s0 + $0x20] sm:$0xff] }
   0x9   :  { %v76_v34 = vld [vmem:[%s2539_s0 + $0x28] sm:$0xff]  ;;  %v88_v35 = vpack.c.bf16 %v74_v32, %v73_v31  ;;  %v77_v37 = vld [vmem:[%s2539_s0 + $0x30] sm:$0xff]  ;;  %v78_v38 = vld [vmem:[%s2539_s0 + $0x38] sm:$0xff] }
   0xa   :  { %1505 = vmatmul.mubr.msk.bf16.vlgmr.msra.gmra.mrb[0].mxu0 %vm120_vm0, %v97_v10  ;;  %v89_v36 = vpack.c.bf16 %v76_v34, %v75_v33  ;;  %v79_v39 = vld [vmem:[%s2539_s0 + $0x40] sm:$0xff]  ;;  %v80_v40 = vld [vmem:[%s2539_s0 + $0x48] sm:$0xff]  ;;  %v90_v41 = vpack.c.bf16 %v78_v38, %v77_v37  ;;  %v81_v43 = vld [vmem:[%s2539_s0 + $0x50] sm:$0xff] }
   0xb   :  { %1521 = vmatpush3.bf16.msra.mxu0 %v269_v12  ;;  %1508 = vmatprep.mubr.msk.bf16.mxu0 %vm120_vm0, %v98_v11  ;;  %v91_v42 = vpack.c.bf16 %v80_v40, %v79_v39  ;;  %v82_v44 = vld [vmem:[%s2539_s0 + $0x58] sm:$0xff]  ;;  %v83_v45 = vld [vmem:[%s2539_s0 + $0x60] sm:$0xff]  ;;  %v84_v46 = vld [vmem:[%s2539_s0 + $0x68] sm:$0xff] }
   0xc   :  { %v92_v47 = vpack.c.bf16 %v82_v44, %v81_v43  ;;  %v93_v48 = vpack.c.bf16 %v84_v46, %v83_v45  ;;  %v85_v49 = vld [vmem:[%s2539_s0 + $0x70] sm:$0xff]  ;;  %v86_v50 = vld [vmem:[%s2539_s0 + $0x78] sm:$0xff]  ;;  %v1924_v52 = vld [vmem:[%s2540_s5] ss:$0 sm:$0xff]  ;;  %s1732_s0 = smov 64  }
   0xd   :  { %v94_v51 = vpack.c.bf16 %v86_v50, %v85_v49  ;;  %v57_v38 = vld [vmem:[%s2541_s2 + $0x10] sm:$0xff]  ;;  %v56_v39 = vld [vmem:[%s2541_s2 + $0x8] sm:$0xff]  ;;  %v59_v40 = vld [vmem:[%s2541_s2 + $0x20] sm:$0xff] }
   0xe   :  { %v60_v43 = vld [vmem:[%s2541_s2 + $0x28] sm:$0xff]  ;;  %v63_v44 = vld [vmem:[%s2541_s2 + $0x40] sm:$0xff]  ;;  %v62_v45 = vld [vmem:[%s2541_s2 + $0x38] sm:$0xff] }
   0xf   :  { %v65_v46 = vld [vmem:[%s2541_s2 + $0x50] sm:$0xff]  ;;  %v66_v49 = vld [vmem:[%s2541_s2 + $0x58] sm:$0xff]  ;;  %v68_v50 = vld [vmem:[%s2541_s2 + $0x68] sm:$0xff] }
  0x12   :  { %1509 = vmatmul.mubr.msk.bf16.gmra.mrb[4].mxu0 %vm120_vm0, %v99_v17 }
  0x13   :  { %1512 = vmatprep.mubr.msk.bf16.mxu0 %vm120_vm0, %v100_v18 }
  0x1a   :  { %1513 = vmatmul.mubr.msk.bf16.gmra.mrb[8].mxu0 %vm120_vm0, %v101_v23 }
  0x1b   :  { %1516 = vmatprep.mubr.msk.bf16.mxu0 %vm120_vm0, %v102_v24 }
  0x22   :  { %1517 = vmatmul.mubr.msk.bf16.gmra.mrb[12].mxu0 %vm120_vm0, %v103_v29 }
  0x23   :  { %1522 = vmatprep.mubr.msk.bf16.mxu0 %vm242_vm2, %v87_v30 }
  0x2a   :  { %1523 = vmatmul.mubr.msk.bf16.vlgmr.msra.gmra.mrb[0].mxu0 %vm242_vm2, %v88_v35 }
  0x2b   :  { %1526 = vmatprep.mubr.msk.bf16.mxu0 %vm242_vm2, %v89_v36  ;;  %v55_v36 = vld [vmem:[%s2541_s2] sm:$0xff] }
  0x32   :  { %1527 = vmatmul.mubr.msk.bf16.gmra.mrb[4].mxu0 %vm242_vm2, %v90_v41  ;;  %v58_v41 = vld [vmem:[%s2541_s2 + $0x18] sm:$0xff] }
  0x33   :  { %1530 = vmatprep.mubr.msk.bf16.mxu0 %vm242_vm2, %v91_v42  ;;  %v61_v42 = vld [vmem:[%s2541_s2 + $0x30] sm:$0xff] }
  0x3a   :  { %1531 = vmatmul.mubr.msk.bf16.gmra.mrb[8].mxu0 %vm242_vm2, %v92_v47  ;;  %v64_v47 = vld [vmem:[%s2541_s2 + $0x48] sm:$0xff] }
  0x3b   :  { %1534 = vmatprep.mubr.msk.bf16.mxu0 %vm242_vm2, %v93_v48  ;;  %v67_v48 = vld [vmem:[%s2541_s2 + $0x60] sm:$0xff] }
  0x42   :  { %1535 = vmatmul.mubr.msk.bf16.gmra.mrb[12].mxu0 %vm242_vm2, %v94_v51 }
  0xfd   :  { %v1524_v53 = vpop.f32.mrb[0].mxu0 }
  0xfe   :  { %v1927_v54 = vadd.f32 %v1524_v53, %v1924_v52  ;;  %v305_v55 = vpop.f32.mrb[1].mxu0 }
  0xff   :  { %v1930_v56 = vadd.f32 %v1924_v52, %v305_v55  ;;  %v1525_v57 = vpop.f32.mrb[2].mxu0 }
 0x100   :  { %1604 = vtanh.f32 %v1927_v54  ;;  %v308_v58 = vpop.f32.mrb[3].mxu0  ;;  %v1935_v59 = vadd.f32 %v1525_v57, %v1924_v52  ;;  %v1425_v51 = vmul.f32 -1.442695, %v1927_v54 }
 0x101   :  { %1606 = vtanh.f32 %v1930_v56  ;;  %v1938_v60 = vadd.f32 %v1924_v52, %v308_v58 }
 0x102   :  { %1608 = vtanh.f32 %v1935_v59  ;;  %v1426_v53 = vmul.f32 -1.442695, %v1935_v59 }
 0x103   :  { %1610 = vtanh.f32 %v1938_v60  ;;  %v1424_v55 = vmul.f32 -1.442695, %v1938_v60 }
 0x105   :  { %v1528_v61 = vpop.f32.mrb[4].mxu0 }
 0x106   :  { %v1942_v62 = vadd.f32 %v1528_v61, %v1924_v52  ;;  %v321_v63 = vpop.f32.mrb[5].mxu0 }
 0x107   :  { %v1529_v0 = vpop.f32.mrb[6].mxu0  ;;  %v1950_v5 = vadd.f32 %v1924_v52, %v321_v63 }
 0x108   :  { %v324_v1 = vpop.f32.mrb[7].mxu0  ;;  %1612 = vtanh.f32 %v1942_v62  ;;  %v1947_v2 = vadd.f32 %v1529_v0, %v1924_v52  ;;  %v1429_v57 = vmul.f32 -1.442695, %v1942_v62 }
 0x109   :  { %v1956_v7 = vadd.f32 %v1924_v52, %v324_v1  ;;  %v1427_v63 = vmul.f32 -1.442695, %v1950_v5 }
 0x10a   :  { %v1605_v3 = vpop.eup %1604  ;;  %1614 = vtanh.f32 %v1947_v2  ;;  %v1430_v58 = vmul.f32 -1.442695, %v1947_v2 }
 0x10b   :  { %v1607_v4 = vpop.eup %1606  ;;  %603 = vrot.lane.b32.xlu1 %v1605_v3, %s1732_s0  ;;  %1616 = vtanh.f32 %v1950_v5 }
 0x10c   :  { %599 = vrot.lane.b32.xlu0 %v1607_v4, %s1732_s0  ;;  %v1609_v9 = vpop.eup %1608  ;;  %1618 = vtanh.f32 %v1956_v7 }
 0x10d   :  { %v1532_v6 = vpop.f32.mrb[8].mxu0  ;;  %v1611_v12 = vpop.eup %1610 }
 0x10e   :  { %v337_v8 = vpop.f32.mrb[9].mxu0  ;;  %v1961_v13 = vadd.f32 %v1532_v6, %v1924_v52 }
 0x10f   :  { %v1533_v10 = vpop.f32.mrb[10].mxu0  ;;  %605 = vrot.lane.b32.xlu1 %v1609_v9, %s1732_s0  ;;  %v1967_v16 = vadd.f32 %v1924_v52, %v337_v8 }
 0x110   :  { %v340_v11 = vpop.f32.mrb[11].mxu0  ;;  %601 = vrot.lane.b32.xlu0 %v1611_v12, %s1732_s0  ;;  %1620 = vtanh.f32 %v1961_v13  ;;  %v1972_v22 = vadd.f32 %v1533_v10, %v1924_v52  ;;  %v1433_v59 = vmul.f32 -1.442695, %v1961_v13 }
 0x111   :  { %1622 = vtanh.f32 %v1967_v16  ;;  %v1978_v24 = vadd.f32 %v1924_v52, %v340_v11  ;;  %v1431_v4 = vmul.f32 -1.442695, %v1967_v16 }
 0x112   :  { %v1613_v14 = vpop.eup %1612  ;;  %1624 = vtanh.f32 %v1972_v22 }
 0x113   :  { %1626 = vtanh.f32 %v1978_v24  ;;  %v1432_v16 = vmul.f32 -1.442695, %v1978_v24 }
 0x114   :  { %611 = vrot.lane.b32.xlu0 %v1613_v14, %s1732_s0  ;;  %v1615_v18 = vpop.eup %1614 }
 0x115   :  { %v1536_v15 = vpop.f32.mrb[12].mxu0  ;;  %613 = vrot.lane.b32.xlu1 %v1615_v18, %s1732_s0  ;;  %v1617_v21 = vpop.eup %1616 }
 0x116   :  { %v353_v17 = vpop.f32.mrb[13].mxu0  ;;  %v1619_v23 = vpop.eup %1618  ;;  %v1982_v25 = vadd.f32 %v1536_v15, %v1924_v52 }
 0x117   :  { %v1537_v19 = vpop.f32.mrb[14].mxu0  ;;  %v1988_v27 = vadd.f32 %v1924_v52, %v353_v17 }
 0x118   :  { %v356_v20 = vpop.f32.mrb[15].mxu0  ;;  %607 = vrot.lane.b32.xlu0 %v1617_v21, %s1732_s0  ;;  %1628 = vtanh.f32 %v1982_v25  ;;  %v1991_v28 = vadd.f32 %v1537_v19, %v1924_v52 }
 0x119   :  { %609 = vrot.lane.b32.xlu1 %v1619_v23, %s1732_s0  ;;  %1630 = vtanh.f32 %v1988_v27  ;;  %v1997_v31 = vadd.f32 %v1924_v52, %v356_v20  ;;  %v1423_v52 = vmul.f32 -1.442695, %v1930_v56  ;;  %v1428_v56 = vmul.f32 -1.442695, %v1956_v7 }
 0x11a   :  { %v1621_v26 = vpop.eup %1620  ;;  %1632 = vtanh.f32 %v1991_v28  ;;  %v1434_v7 = vmul.f32 -1.442695, %v1972_v22 }
 0x11b   :  { %v1623_v29 = vpop.eup %1622  ;;  %1634 = vtanh.f32 %v1997_v31 }
 0x11c   :  { %619 = vrot.lane.b32.xlu0 %v1621_v26, %s1732_s0  ;;  %v1625_v30 = vpop.eup %1624  ;;  %1636 = vpow2.f32 %v1425_v51 }
 0x11d   :  { %621 = vrot.lane.b32.xlu1 %v1625_v30, %s1732_s0  ;;  %v1627_v32 = vpop.eup %1626  ;;  %1638 = vpow2.f32 %v1423_v52  ;;  %v1435_v30 = vmul.f32 -1.442695, %v1988_v27 }
 0x11e   :  { %1640 = vpow2.f32 %v1426_v53 }
 0x11f   :  { %1642 = vpow2.f32 %v1424_v55 }
 0x120   :  { %615 = vrot.lane.b32.xlu0 %v1623_v29, %s1732_s0  ;;  %1644 = vpow2.f32 %v1429_v57 }
 0x121   :  { %617 = vrot.lane.b32.xlu1 %v1627_v32, %s1732_s0  ;;  %1646 = vpow2.f32 %v1430_v58 }
 0x122   :  { %v1629_v33 = vpop.eup %1628  ;;  %1648 = vpow2.f32 %v1427_v63 }
 0x123   :  { %v1631_v34 = vpop.eup %1630 }
 0x124   :  { %627 = vrot.lane.b32.xlu0 %v1629_v33, %s1732_s0  ;;  %v1633_v35 = vpop.eup %1632 }
 0x125   :  { %629 = vrot.lane.b32.xlu1 %v1633_v35, %s1732_s0  ;;  %v1635_v37 = vpop.eup %1634 }
 0x126   :  { %v1637_v61 = vpop.eup %1636 }
 0x127   :  { %v441_v0 = vadd.f32 1.0, %v1637_v61  ;;  %v1639_v54 = vpop.eup %1638 }
 0x128   :  { %623 = vrot.lane.b32.xlu0 %v1631_v34, %s1732_s0  ;;  %v1641_v1 = vpop.eup %1640  ;;  %v439_v60 = vadd.f32 1.0, %v1639_v54  ;;  %v1437_v34 = vmul.f32 -1.442695, %v1982_v25 }
 0x129   :  { %625 = vrot.lane.b32.xlu1 %v1635_v37, %s1732_s0  ;;  %1650 = vrcp.f32 %v441_v0  ;;  %v442_v3 = vadd.f32 1.0, %v1641_v1  ;;  %v1643_v62 = vpop.eup %1642 }
 0x12a   :  { %1652 = vpow2.f32 %v1428_v56  ;;  %v1645_v2 = vpop.eup %1644  ;;  %v440_v5 = vadd.f32 1.0, %v1643_v62 }
 0x12b   :  { %1654 = vpow2.f32 %v1433_v59  ;;  %v1647_v6 = vpop.eup %1646  ;;  %v445_v8 = vadd.f32 1.0, %v1645_v2  ;;  %v69_v2 = vld [vmem:[%s2541_s2 + $0x70] sm:$0xff] }
 0x12c   :  { %519 = vrot.lane.b32.xlu0 %v55_v36, %s1733_s14  ;;  %1656 = vrcp.f32 %v439_v60  ;;  %v1649_v9 = vpop.eup %1648  ;;  %v446_v10 = vadd.f32 1.0, %v1647_v6 }
 0x12d   :  { %521 = vrot.lane.b32.xlu1 %v56_v39, %s1733_s14  ;;  %1658 = vrcp.f32 %v442_v3  ;;  %v443_v14 = vadd.f32 1.0, %v1649_v9  ;;  %v1436_v39 = vmul.f32 -1.442695, %v1997_v31  ;;  %v1438_v31 = vmul.f32 -1.442695, %v1991_v28 }
 0x12e   :  { %1660 = vpow2.f32 %v1431_v4 }
 0x12f   :  { %1662 = vrcp.f32 %v440_v5 }
 0x130   :  { %523 = vrot.lane.b32.xlu0 %v57_v38, %s1733_s14  ;;  %1664 = vrcp.f32 %v445_v8 }
 0x131   :  { %525 = vrot.lane.b32.xlu1 %v58_v41, %s1733_s14  ;;  %1666 = vpow2.f32 %v1434_v7  ;;  %v70_v7 = vld [vmem:[%s2541_s2 + $0x78] sm:$0xff] }
 0x132   :  { %1668 = vrcp.f32 %v446_v10 }
 0x133   :  { %v2073_v11 = vpop.eup %1650  ;;  %1670 = vrcp.f32 %v443_v14 }
 0x134   :  { %527 = vrot.lane.b32.xlu0 %v59_v40, %s1733_s14  ;;  %v1653_v13 = vpop.eup %1652  ;;  %1672 = vpow2.f32 %v1432_v16 }
 0x135   :  { %529 = vrot.lane.b32.xlu1 %v60_v43, %s1733_s14  ;;  %v1655_v18 = vpop.eup %1654  ;;  %v444_v20 = vadd.f32 1.0, %v1653_v13 }
 0x136   :  { %v2078_v19 = vpop.eup %1656  ;;  %v449_v26 = vadd.f32 1.0, %v1655_v18 }
 0x137   :  { %v2080_v21 = vpop.eup %1658  ;;  %1674 = vrcp.f32 %v444_v20 }
 0x138   :  { %531 = vrot.lane.b32.xlu0 %v61_v42, %s1733_s14  ;;  %v1661_v32 = vpop.eup %1660  ;;  %1676 = vrcp.f32 %v449_v26 }
 0x139   :  { %533 = vrot.lane.b32.xlu1 %v62_v45, %s1733_s14  ;;  %v2087_v33 = vpop.eup %1662  ;;  %v447_v37 = vadd.f32 1.0, %v1661_v32  ;;  %1678 = vpow2.f32 %v1435_v30 }
 0x13a   :  { %v2091_v36 = vpop.eup %1664  ;;  %1680 = vpow2.f32 %v1437_v34 }
 0x13b   :  { %v1667_v27 = vpop.eup %1666  ;;  %1682 = vrcp.f32 %v447_v37 }
 0x13c   :  { %535 = vrot.lane.b32.xlu0 %v63_v44, %s1733_s14  ;;  %v2096_v41 = vpop.eup %1668  ;;  %v450_v44 = vadd.f32 1.0, %v1667_v27  ;;  %1684 = vpow2.f32 %v1436_v39 }
 0x13d   :  { %537 = vrot.lane.b32.xlu1 %v64_v47, %s1733_s14  ;;  %v2100_v43 = vpop.eup %1670 }
 0x13e   :  { %1686 = vrcp.f32 %v450_v44 }
 0x13f   :  { %1688 = vpow2.f32 %v1438_v31 }
 0x140   :  { %539 = vrot.lane.b32.xlu0 %v65_v46, %s1733_s14  ;;  %v1673_v46 = vpop.eup %1672 }
 0x141   :  { %541 = vrot.lane.b32.xlu1 %v66_v49, %s1733_s14 }
 0x144   :  { %543 = vrot.lane.b32.xlu0 %v67_v48, %s1733_s14  ;;  %v2105_v48 = vpop.eup %1674 }
 0x145   :  { %545 = vrot.lane.b32.xlu1 %v68_v50, %s1733_s14  ;;  %v448_v50 = vadd.f32 1.0, %v1673_v46  ;;  %v2109_v52 = vpop.eup %1676 }
 0x146   :  { %v1679_v53 = vpop.eup %1678 }
 0x147   :  { %1690 = vrcp.f32 %v448_v50  ;;  %v1681_v57 = vpop.eup %1680  ;;  %v451_v58 = vadd.f32 1.0, %v1679_v53 }
 0x148   :  { %v2114_v61 = vpop.eup %1682  ;;  %v453_v56 = vadd.f32 1.0, %v1681_v57 }
 0x149   :  { %v1685_v63 = vpop.eup %1684  ;;  %1692 = vrcp.f32 %v451_v58 }
 0x14a   :  { %v2117_v1 = vpop.eup %1686  ;;  %v452_v59 = vadd.f32 1.0, %v1685_v63  ;;  %1694 = vrcp.f32 %v453_v56 }
 0x14b   :  { %v1689_v3 = vpop.eup %1688 }
 0x14c   :  { %v454_v5 = vadd.f32 1.0, %v1689_v3  ;;  %1696 = vrcp.f32 %v452_v59 }
 0x14e   :  { %1698 = vrcp.f32 %v454_v5 }
 0x151   :  { %v2125_v4 = vpop.eup %1690 }
 0x153   :  { %v2133_v10 = vpop.eup %1692 }
 0x17d   :  { %v604_v12 = vpop.permute.xlu1 %603 }
 0x17e   :  { %v649_v15 = vmul.f32 %v2073_v11, %v604_v12  ;;  %v600_v17 = vpop.permute.xlu0 %599 }
 0x17f   :  { %v647_v22 = vmul.f32 %v2078_v19, %v600_v17 }
 0x180   :  { %683 = vrot.lane.b32.xlu0 %v649_v15, %s1733_s14  ;;  %v2138_v15 = vpop.eup %1694 }
 0x181   :  { %v606_v23 = vpop.permute.xlu1 %605  ;;  %v2140_v17 = vpop.eup %1696 }
 0x182   :  { %v650_v29 = vmul.f32 %v2080_v21, %v606_v23  ;;  %v602_v24 = vpop.permute.xlu0 %601 }
 0x183   :  { %v648_v35 = vmul.f32 %v2087_v33, %v602_v24 }
 0x184   :  { %679 = vrot.lane.b32.xlu0 %v647_v22, %s1733_s14  ;;  %685 = vrot.lane.b32.xlu1 %v650_v29, %s1733_s14  ;;  %v2146_v22 = vpop.eup %1698 }
 0x186   :  { %v612_v38 = vpop.permute.xlu0 %611 }
 0x187   :  { %v653_v40 = vmul.f32 %v2091_v36, %v612_v38  ;;  %v614_v42 = vpop.permute.xlu1 %613 }
 0x188   :  { %681 = vrot.lane.b32.xlu1 %v648_v35, %s1733_s14  ;;  %v654_v25 = vmul.f32 %v2096_v41, %v614_v42 }
 0x189   :  { %691 = vrot.lane.b32.xlu0 %v653_v40, %s1733_s14 }
 0x18a   :  { %v608_v45 = vpop.permute.xlu0 %607 }
 0x18b   :  { %v651_v47 = vmul.f32 %v2100_v43, %v608_v45  ;;  %v610_v49 = vpop.permute.xlu1 %609 }
 0x18c   :  { %693 = vrot.lane.b32.xlu1 %v654_v25, %s1733_s14  ;;  %v652_v51 = vmul.f32 %v2105_v48, %v610_v49 }
 0x18d   :  { %687 = vrot.lane.b32.xlu0 %v651_v47, %s1733_s14 }
 0x18e   :  { %v620_v55 = vpop.permute.xlu0 %619 }
 0x18f   :  { %v657_v28 = vmul.f32 %v2109_v52, %v620_v55  ;;  %v622_v60 = vpop.permute.xlu1 %621 }
 0x190   :  { %689 = vrot.lane.b32.xlu1 %v652_v51, %s1733_s14  ;;  %v658_v62 = vmul.f32 %v2117_v1, %v622_v60 }
 0x191   :  { %699 = vrot.lane.b32.xlu0 %v657_v28, %s1733_s14 }
 0x192   :  { %v616_v0 = vpop.permute.xlu0 %615 }
 0x193   :  { %v655_v54 = vmul.f32 %v2114_v61, %v616_v0  ;;  %v618_v6 = vpop.permute.xlu1 %617 }
 0x194   :  { %701 = vrot.lane.b32.xlu1 %v658_v62, %s1733_s14  ;;  %v656_v8 = vmul.f32 %v2125_v4, %v618_v6 }
 0x195   :  { %695 = vrot.lane.b32.xlu0 %v655_v54, %s1733_s14 }
 0x196   :  { %v628_v9 = vpop.permute.xlu0 %627 }
 0x197   :  { %v630_v13 = vpop.permute.xlu1 %629  ;;  %v661_v16 = vmul.f32 %v2138_v15, %v628_v9 }
 0x198   :  { %697 = vrot.lane.b32.xlu1 %v656_v8, %s1733_s14  ;;  %v662_v23 = vmul.f32 %v2146_v22, %v630_v13 }
 0x199   :  { %547 = vrot.lane.b32.xlu0 %v69_v2, %s1733_s14 }
 0x19a   :  { %v624_v12 = vpop.permute.xlu0 %623 }
 0x19b   :  { %v659_v14 = vmul.f32 %v2133_v10, %v624_v12  ;;  %v626_v18 = vpop.permute.xlu1 %625 }
 0x19c   :  { %549 = vrot.lane.b32.xlu1 %v70_v7, %s1733_s14  ;;  %v660_v20 = vmul.f32 %v2140_v17, %v626_v18 }
 0x19d   :  { %703 = vrot.lane.b32.xlu0 %v659_v14, %s1733_s14 }
 0x19e   :  { %v520_v26 = vpop.permute.xlu0 %519 }
 0x19f   :  { %v522_v29 = vpop.permute.xlu1 %521  ;;  %v567_v45 = vmul.f32 %v2078_v19, %v520_v26 }
 0x1a0   :  { %705 = vrot.lane.b32.xlu1 %v660_v20, %s1733_s14  ;;  %v568_v51 = vmul.f32 %v2087_v33, %v522_v29 }
 0x1a1   :  { %707 = vrot.lane.b32.xlu0 %v661_v16, %s1733_s14 }
 0x1a2   :  { %v524_v30 = vpop.permute.xlu0 %523 }
 0x1a3   :  { %v526_v24 = vpop.permute.xlu1 %525  ;;  %v569_v31 = vmul.f32 %v2073_v11, %v524_v30 }
 0x1a4   :  { %709 = vrot.lane.b32.xlu1 %v662_v23, %s1733_s14  ;;  %v570_v55 = vmul.f32 %v2080_v21, %v526_v24 }
 0x1a6   :  { %v528_v32 = vpop.permute.xlu0 %527 }
 0x1a7   :  { %v530_v34 = vpop.permute.xlu1 %529  ;;  %v571_v0 = vmul.f32 %v2100_v43, %v528_v32 }
 0x1a8   :  { %v572_v3 = vmul.f32 %v2105_v48, %v530_v34 }
 0x1aa   :  { %v532_v35 = vpop.permute.xlu0 %531 }
 0x1ab   :  { %v534_v37 = vpop.permute.xlu1 %533  ;;  %v573_v56 = vmul.f32 %v2091_v36, %v532_v35 }
 0x1ac   :  { %v574_v5 = vmul.f32 %v2096_v41, %v534_v37 }
 0x1ae   :  { %v536_v38 = vpop.permute.xlu0 %535 }
 0x1af   :  { %v538_v27 = vpop.permute.xlu1 %537  ;;  %v575_v13 = vmul.f32 %v2114_v61, %v536_v38 }
 0x1b0   :  { %v576_v32 = vmul.f32 %v2125_v4, %v538_v27 }
 0x1b2   :  { %v540_v39 = vpop.permute.xlu0 %539 }
 0x1b3   :  { %v542_v40 = vpop.permute.xlu1 %541  ;;  %v577_v18 = vmul.f32 %v2109_v52, %v540_v39 }
 0x1b4   :  { %v578_v37 = vmul.f32 %v2117_v1, %v542_v40 }
 0x1b6   :  { %v2150_v42 = vpop.permute.xlu0 %543 }
 0x1b7   :  { %v2152_v44 = vpop.permute.xlu1 %545  ;;  %v579_v27 = vmul.f32 %v2133_v10, %v2150_v42 }
 0x1f2   :  { %v684_v25 = vpop.permute.xlu0 %683 }
 0x1f3   :  { %v2158_v50 = vadd.f32 %v684_v25, %v569_v31 }
 0x1f6   :  { %v680_v46 = vpop.permute.xlu0 %679  ;;  %v686_v49 = vpop.permute.xlu1 %685 }
 0x1f7   :  { %v2156_v47 = vadd.f32 %v680_v46, %v567_v45  ;;  %v2166_v58 = vadd.f32 %v686_v49, %v570_v55 }
 0x1f9   :  { %1700 = vtanh.f32 %v2156_v47 }
 0x1fa   :  { %v682_v53 = vpop.permute.xlu1 %681  ;;  %1702 = vtanh.f32 %v2158_v50 }
 0x1fb   :  { %v2163_v28 = vadd.f32 %v682_v53, %v568_v51  ;;  %v692_v57 = vpop.permute.xlu0 %691  ;;  %v580_v51 = vmul.f32 %v2140_v17, %v2152_v44 }
 0x1fc   :  { %v2175_v62 = vadd.f32 %v692_v57, %v573_v56 }
 0x1fd   :  { %1704 = vtanh.f32 %v2163_v28 }
 0x1fe   :  { %v694_v63 = vpop.permute.xlu1 %693  ;;  %1706 = vtanh.f32 %v2166_v58 }
 0x1ff   :  { %v688_v54 = vpop.permute.xlu0 %687  ;;  %v2182_v9 = vadd.f32 %v694_v63, %v574_v5 }
 0x200   :  { %v2172_v59 = vadd.f32 %v688_v54, %v571_v0 }
 0x202   :  { %1708 = vtanh.f32 %v2172_v59  ;;  %v690_v2 = vpop.permute.xlu1 %689 }
 0x203   :  { %v1701_v60 = vpop.eup %1700  ;;  %v2180_v6 = vadd.f32 %v690_v2, %v572_v3  ;;  %v700_v7 = vpop.permute.xlu0 %699 }
 0x204   :  { %775 = vrot.lane.b32.xlu0 %v1701_v60, %s1732_s0  ;;  %v1703_v8 = vpop.eup %1702  ;;  %v2194_v26 = vadd.f32 %v700_v7, %v577_v18  ;;  %v1600_v7 = vld [vmem:[%s2542_s6] sm:$0xff]  }
 0x205   :  { %1710 = vtanh.f32 %v2180_v6  ;;  %1538 = vmatprep.subr.bf16.mxu1 %v1600_v7 }
 0x206   :  { %1712 = vtanh.f32 %v2175_v62  ;;  %v702_v29 = vpop.permute.xlu1 %701  ;;  %1539 = vmatpush3.bf16.msra.mxu1 %v1600_v7 }
 0x207   :  { %v1705_v12 = vpop.eup %1704  ;;  %1714 = vtanh.f32 %v2182_v9  ;;  %v696_v16 = vpop.permute.xlu0 %695  ;;  %v2205_v25 = vadd.f32 %v702_v29, %v578_v37 }
 0x208   :  { %779 = vrot.lane.b32.xlu0 %v1703_v8, %s1732_s0  ;;  %777 = vrot.lane.b32.xlu1 %v1705_v12, %s1732_s0  ;;  %v1707_v14 = vpop.eup %1706  ;;  %v2191_v20 = vadd.f32 %v696_v16, %v575_v13  ;;  %v1601_v12 = vld [vmem:[%s2542_s6 + $0x8] sm:$0xff]   ;;  %s1734_s6 = smov 96  }
 0x209   :  { %1540 = vmatprep.subr.bf16.mxu1 %v1601_v12 }
 0x20a   :  { %1716 = vtanh.f32 %v2191_v20  ;;  %v698_v35 = vpop.permute.xlu1 %697  ;;  %1541 = vmatpush3.bf16.msra.mxu1 %v1601_v12 }
 0x20b   :  { %v548_v34 = vpop.permute.xlu0 %547  ;;  %1718 = vtanh.f32 %v2194_v26  ;;  %v2203_v38 = vadd.f32 %v698_v35, %v576_v32 }
 0x20c   :  { %781 = vrot.lane.b32.xlu1 %v1707_v14, %s1732_s0  ;;  %v1709_v23 = vpop.eup %1708  ;;  %v581_v40 = vmul.f32 %v2138_v15, %v548_v34 }
 0x20d   :  { %783 = vrot.lane.b32.xlu0 %v1709_v23, %s1732_s0  ;;  %1720 = vtanh.f32 %v2203_v38 }
 0x20e   :  { %v550_v45 = vpop.permute.xlu1 %549  ;;  %1722 = vtanh.f32 %v2205_v25 }
 0x20f   :  { %v1711_v30 = vpop.eup %1710  ;;  %v704_v46 = vpop.permute.xlu0 %703  ;;  %v582_v54 = vmul.f32 %v2146_v22, %v550_v45 }
 0x210   :  { %v1713_v24 = vpop.eup %1712  ;;  %785 = vrot.lane.b32.xlu1 %v1711_v30, %s1732_s0  ;;  %v2211_v49 = vadd.f32 %v704_v46, %v579_v27 }
 0x211   :  { %787 = vrot.lane.b32.xlu0 %v1713_v24, %s1732_s0  ;;  %v1715_v39 = vpop.eup %1714 }
 0x212   :  { %1724 = vtanh.f32 %v2211_v49  ;;  %v706_v57 = vpop.permute.xlu1 %705 }
 0x213   :  { %v708_v53 = vpop.permute.xlu0 %707  ;;  %v2221_v63 = vadd.f32 %v706_v57, %v580_v51 }
 0x214   :  { %789 = vrot.lane.b32.xlu1 %v1715_v39, %s1732_s0  ;;  %v1717_v31 = vpop.eup %1716  ;;  %v2219_v42 = vadd.f32 %v708_v53, %v581_v40 }
 0x215   :  { %791 = vrot.lane.b32.xlu0 %v1717_v31, %s1732_s0  ;;  %v1719_v55 = vpop.eup %1718 }
 0x216   :  { %1726 = vtanh.f32 %v2219_v42  ;;  %v710_v56 = vpop.permute.xlu1 %709 }
 0x217   :  { %v1721_v0 = vpop.eup %1720  ;;  %1728 = vtanh.f32 %v2221_v63  ;;  %v2228_v44 = vadd.f32 %v710_v56, %v582_v54 }
 0x218   :  { %793 = vrot.lane.b32.xlu1 %v1721_v0, %s1732_s0  ;;  %v1723_v60 = vpop.eup %1722 }
 0x219   :  { %795 = vrot.lane.b32.xlu0 %v1719_v55, %s1732_s0  ;;  %1730 = vtanh.f32 %v2228_v44 }
 0x21c   :  { %v1725_v3 = vpop.eup %1724  ;;  %797 = vrot.lane.b32.xlu1 %v1723_v60, %s1732_s0 }
 0x21d   :  { %799 = vrot.lane.b32.xlu0 %v1725_v3, %s1732_s0 }
 0x220   :  { %v1727_v2 = vpop.eup %1726 }
 0x221   :  { %v1729_v5 = vpop.eup %1728  ;;  %803 = vrot.lane.b32.xlu0 %v1727_v2, %s1732_s0 }
 0x222   :  { %801 = vrot.lane.b32.xlu1 %v1729_v5, %s1732_s0 }
 0x223   :  { %v1731_v8 = vpop.eup %1730 }
 0x226   :  { %805 = vrot.lane.b32.xlu1 %v1731_v8, %s1732_s0 }
 0x276   :  { %v776_v13 = vpop.permute.xlu0 %775 }
 0x277   :  { %v823_v18 = vmul.f32 %v2078_v19, %v776_v13 }
 0x27a   :  { %v780_v14 = vpop.permute.xlu0 %779  ;;  %v778_v16 = vpop.permute.xlu1 %777 }
 0x27b   :  { %v824_v23 = vmul.f32 %v2087_v33, %v778_v16  ;;  %v825_v24 = vmul.f32 %v2073_v11, %v780_v14 }
 0x27d   :  { %v999_v29 = vpack.c.bf16 %v824_v23, %v823_v18 }
 0x27e   :  { %v782_v30 = vpop.permute.xlu1 %781 }
 0x27f   :  { %v826_v32 = vmul.f32 %v2080_v21, %v782_v30  ;;  %1026 = vrot.lane.b32.xlu0 %v999_v29, %s1733_s14  ;;  %v784_v34 = vpop.permute.xlu0 %783 }
 0x280   :  { %v827_v39 = vmul.f32 %v2100_v43, %v784_v34 }
 0x281   :  { %v1000_v35 = vpack.c.bf16 %v826_v32, %v825_v24 }
 0x282   :  { %v786_v37 = vpop.permute.xlu1 %785 }
 0x283   :  { %1028 = vrot.lane.b32.xlu1 %v1000_v35, %s1733_s14  ;;  %v828_v27 = vmul.f32 %v2105_v48, %v786_v37  ;;  %v788_v19 = vpop.permute.xlu0 %787 }
 0x284   :  { %v829_v46 = vmul.f32 %v2091_v36, %v788_v19 }
 0x285   :  { %v1001_v45 = vpack.c.bf16 %v828_v27, %v827_v39 }
 0x286   :  { %v790_v33 = vpop.permute.xlu1 %789 }
 0x287   :  { %v830_v11 = vmul.f32 %v2096_v41, %v790_v33  ;;  %1030 = vrot.lane.b32.xlu0 %v1001_v45, %s1733_s14  ;;  %v792_v31 = vpop.permute.xlu0 %791 }
 0x288   :  { %v831_v53 = vmul.f32 %v2114_v61, %v792_v31 }
 0x289   :  { %v1002_v21 = vpack.c.bf16 %v830_v11, %v829_v46 }
 0x28a   :  { %v794_v40 = vpop.permute.xlu1 %793 }
 0x28b   :  { %1032 = vrot.lane.b32.xlu1 %v1002_v21, %s1733_s14  ;;  %v796_v51 = vpop.permute.xlu0 %795  ;;  %v832_v43 = vmul.f32 %v2125_v4, %v794_v40 }
 0x28c   :  { %v833_v57 = vmul.f32 %v2109_v52, %v796_v51 }
 0x28d   :  { %v1003_v48 = vpack.c.bf16 %v832_v43, %v831_v53 }
 0x28e   :  { %v798_v55 = vpop.permute.xlu1 %797 }
 0x28f   :  { %v834_v36 = vmul.f32 %v2117_v1, %v798_v55  ;;  %1034 = vrot.lane.b32.xlu0 %v1003_v48, %s1733_s14  ;;  %v800_v41 = vpop.permute.xlu0 %799 }
 0x290   :  { %v835_v56 = vmul.f32 %v2133_v10, %v800_v41  ;;  %v1602_v10 = vld [vmem:[%s2543_s8] sm:$0xff]  }
 0x291   :  { %v1004_v0 = vpack.c.bf16 %v834_v36, %v833_v57  ;;  %1558 = vmatprep.subr.bf16.mxu1 %v1602_v10 }
 0x293   :  { %1036 = vrot.lane.b32.xlu1 %v1004_v0, %s1733_s14  ;;  %v804_v61 = vpop.permute.xlu0 %803 }
 0x294   :  { %v802_v54 = vpop.permute.xlu1 %801  ;;  %v837_v2 = vmul.f32 %v2138_v15, %v804_v61 }
 0x295   :  { %v836_v60 = vmul.f32 %v2140_v17, %v802_v54  ;;  %v1603_v17 = vld [vmem:[%s2543_s8 + $0x8] sm:$0xff]  }
 0x297   :  { %v1005_v3 = vpack.c.bf16 %v836_v60, %v835_v56 }
 0x298   :  { %v806_v4 = vpop.permute.xlu1 %805 }
 0x299   :  { %v838_v52 = vmul.f32 %v2146_v22, %v806_v4  ;;  %1038 = vrot.lane.b32.xlu0 %v1005_v3, %s1733_s14 }
 0x29b   :  { %v1006_v1 = vpack.c.bf16 %v838_v52, %v837_v2 }
 0x29d   :  { %855 = vrot.lane.b32.xlu0 %v823_v18, %s1733_s14  ;;  %1040 = vrot.lane.b32.xlu1 %v1006_v1, %s1733_s14 }
 0x2a1   :  { %859 = vrot.lane.b32.xlu0 %v825_v24, %s1733_s14  ;;  %857 = vrot.lane.b32.xlu1 %v824_v23, %s1733_s14 }
 0x2a5   :  { %863 = vrot.lane.b32.xlu0 %v827_v39, %s1733_s14  ;;  %861 = vrot.lane.b32.xlu1 %v826_v32, %s1733_s14 }
 0x2a9   :  { %867 = vrot.lane.b32.xlu0 %v829_v46, %s1733_s14  ;;  %865 = vrot.lane.b32.xlu1 %v828_v27, %s1733_s14 }
 0x2ad   :  { %871 = vrot.lane.b32.xlu0 %v831_v53, %s1733_s14  ;;  %869 = vrot.lane.b32.xlu1 %v830_v11, %s1733_s14  ;;  %v2443_v11 = vld [vmem:[%s2546_s7] ss:$0 sm:$0xff] }
 0x2b1   :  { %875 = vrot.lane.b32.xlu0 %v833_v57, %s1733_s14  ;;  %873 = vrot.lane.b32.xlu1 %v832_v43, %s1733_s14 }
 0x2b5   :  { %879 = vrot.lane.b32.xlu0 %v835_v56, %s1733_s14  ;;  %877 = vrot.lane.b32.xlu1 %v834_v36, %s1733_s14 }
 0x2b9   :  { %883 = vrot.lane.b32.xlu0 %v837_v2, %s1733_s14  ;;  %881 = vrot.lane.b32.xlu1 %v836_v60, %s1733_s14 }
 0x2bd   :  { %935 = vrot.lane.b32.xlu0 %v2156_v47, %s1734_s6  ;;  %885 = vrot.lane.b32.xlu1 %v838_v52, %s1733_s14 }
 0x2c1   :  { %939 = vrot.lane.b32.xlu0 %v2158_v50, %s1734_s6  ;;  %937 = vrot.lane.b32.xlu1 %v2163_v28, %s1734_s6 }
 0x2c5   :  { %943 = vrot.lane.b32.xlu0 %v2172_v59, %s1734_s6  ;;  %941 = vrot.lane.b32.xlu1 %v2166_v58, %s1734_s6 }
 0x2c9   :  { %947 = vrot.lane.b32.xlu0 %v2175_v62, %s1734_s6  ;;  %945 = vrot.lane.b32.xlu1 %v2180_v6, %s1734_s6 }
 0x2cd   :  { %951 = vrot.lane.b32.xlu0 %v2191_v20, %s1734_s6  ;;  %949 = vrot.lane.b32.xlu1 %v2182_v9, %s1734_s6 }
 0x2d1   :  { %955 = vrot.lane.b32.xlu0 %v2194_v26, %s1734_s6  ;;  %953 = vrot.lane.b32.xlu1 %v2203_v38, %s1734_s6 }
 0x2d5   :  { %959 = vrot.lane.b32.xlu0 %v2211_v49, %s1734_s6  ;;  %957 = vrot.lane.b32.xlu1 %v2205_v25, %s1734_s6 }
 0x2d9   :  { %963 = vrot.lane.b32.xlu0 %v2219_v42, %s1734_s6  ;;  %961 = vrot.lane.b32.xlu1 %v2221_v63, %s1734_s6 }
 0x2dd   :  { %965 = vrot.lane.b32.xlu1 %v2228_v44, %s1734_s6 }
 0x2f1   :  { %v1027_v15 = vpop.permute.xlu0 %1026 }
 0x2f2   :  { %1542 = vmatprep.mubr.msk.bf16.mxu1 %vm120_vm0, %v1027_v15 }
 0x2f5   :  { %v1029_v22 = vpop.permute.xlu1 %1028 }
 0x2f6   :  { %1543 = vmatmul.mubr.msk.bf16.vlgmr.msra.gmra.mrb[0].mxu1 %vm120_vm0, %v1029_v22 }
 0x2f7   :  { %1559 = vmatpush3.bf16.msra.mxu1 %v1602_v10 }
 0x2f8   :  { %1560 = vmatprep.subr.bf16.mxu1 %v1603_v17 }
 0x2f9   :  { %v1031_v47 = vpop.permute.xlu0 %1030 }
 0x2fa   :  { %1546 = vmatprep.mubr.msk.bf16.mxu1 %vm120_vm0, %v1031_v47 }
 0x2fb   :  { %1561 = vmatpush3.bf16.msra.mxu1 %v1603_v17 }
 0x2fd   :  { %v1033_v50 = vpop.permute.xlu1 %1032 }
 0x2fe   :  { %1547 = vmatmul.mubr.msk.bf16.gmra.mrb[4].mxu1 %vm120_vm0, %v1033_v50 }
 0x301   :  { %v1035_v28 = vpop.permute.xlu0 %1034 }
 0x302   :  { %1550 = vmatprep.mubr.msk.bf16.mxu1 %vm120_vm0, %v1035_v28 }
 0x305   :  { %v1037_v58 = vpop.permute.xlu1 %1036 }
 0x306   :  { %1551 = vmatmul.mubr.msk.bf16.gmra.mrb[8].mxu1 %vm120_vm0, %v1037_v58 }
 0x30b   :  { %v1039_v59 = vpop.permute.xlu0 %1038 }
 0x30c   :  { %1554 = vmatprep.mubr.msk.bf16.mxu1 %vm120_vm0, %v1039_v59 }
 0x30f   :  { %v856_v62 = vpop.permute.xlu0 %855  ;;  %v1041_v6 = vpop.permute.xlu1 %1040 }
 0x310   :  { %903 = vst.msk [vmem:[%s2544_s11] sm:$0xff] %vm120_vm0, %v856_v62  ;;  %1555 = vmatmul.mubr.msk.bf16.gmra.mrb[12].mxu1 %vm120_vm0, %v1041_v6 }
 0x313   :  { %v860_v9 = vpop.permute.xlu0 %859  ;;  %v858_v20 = vpop.permute.xlu1 %857 }
 0x314   :  { %905 = vst.msk [vmem:[%s2544_s11 + $0x10] sm:$0xff] %vm120_vm0, %v860_v9  ;;  %904 = vst.msk [vmem:[%s2544_s11 + $0x8] sm:$0xff] %vm120_vm0, %v858_v20 }
 0x317   :  { %v864_v26 = vpop.permute.xlu0 %863  ;;  %v862_v38 = vpop.permute.xlu1 %861 }
 0x318   :  { %907 = vst.msk [vmem:[%s2544_s11 + $0x20] sm:$0xff] %vm120_vm0, %v864_v26  ;;  %906 = vst.msk [vmem:[%s2544_s11 + $0x18] sm:$0xff] %vm120_vm0, %v862_v38 }
 0x31b   :  { %v868_v25 = vpop.permute.xlu0 %867  ;;  %v866_v49 = vpop.permute.xlu1 %865 }
 0x31c   :  { %909 = vst.msk [vmem:[%s2544_s11 + $0x30] sm:$0xff] %vm120_vm0, %v868_v25  ;;  %908 = vst.msk [vmem:[%s2544_s11 + $0x28] sm:$0xff] %vm120_vm0, %v866_v49 }
 0x31f   :  { %v872_v42 = vpop.permute.xlu0 %871  ;;  %v870_v63 = vpop.permute.xlu1 %869 }
 0x320   :  { %911 = vst.msk [vmem:[%s2544_s11 + $0x40] sm:$0xff] %vm120_vm0, %v872_v42  ;;  %910 = vst.msk [vmem:[%s2544_s11 + $0x38] sm:$0xff] %vm120_vm0, %v870_v63 }
 0x323   :  { %v876_v44 = vpop.permute.xlu0 %875  ;;  %v874_v5 = vpop.permute.xlu1 %873 }
 0x324   :  { %913 = vst.msk [vmem:[%s2544_s11 + $0x50] sm:$0xff] %vm120_vm0, %v876_v44  ;;  %912 = vst.msk [vmem:[%s2544_s11 + $0x48] sm:$0xff] %vm120_vm0, %v874_v5 }
 0x327   :  { %v880_v8 = vpop.permute.xlu0 %879  ;;  %v878_v7 = vpop.permute.xlu1 %877 }
 0x328   :  { %915 = vst.msk [vmem:[%s2544_s11 + $0x60] sm:$0xff] %vm120_vm0, %v880_v8  ;;  %914 = vst.msk [vmem:[%s2544_s11 + $0x58] sm:$0xff] %vm120_vm0, %v878_v7 }
 0x32b   :  { %v884_v12 = vpop.permute.xlu0 %883  ;;  %v882_v13 = vpop.permute.xlu1 %881 }
 0x32c   :  { %917 = vst.msk [vmem:[%s2544_s11 + $0x70] sm:$0xff] %vm120_vm0, %v884_v12  ;;  %916 = vst.msk [vmem:[%s2544_s11 + $0x68] sm:$0xff] %vm120_vm0, %v882_v13 }
 0x32f   :  { %v936_v14 = vpop.permute.xlu0 %935  ;;  %v886_v16 = vpop.permute.xlu1 %885 }
 0x330   :  { %983 = vst.msk [vmem:[%s2545_s12] sm:$0xff] %vm120_vm0, %v936_v14  ;;  %918 = vst.msk [vmem:[%s2544_s11 + $0x78] sm:$0xff] %vm120_vm0, %v886_v16 }
 0x333   :  { %v940_v18 = vpop.permute.xlu0 %939  ;;  %v938_v23 = vpop.permute.xlu1 %937 }
 0x334   :  { %985 = vst.msk [vmem:[%s2545_s12 + $0x10] sm:$0xff] %vm120_vm0, %v940_v18  ;;  %984 = vst.msk [vmem:[%s2545_s12 + $0x8] sm:$0xff] %vm120_vm0, %v938_v23 }
 0x337   :  { %v944_v29 = vpop.permute.xlu0 %943  ;;  %v942_v30 = vpop.permute.xlu1 %941 }
 0x338   :  { %987 = vst.msk [vmem:[%s2545_s12 + $0x20] sm:$0xff] %vm120_vm0, %v944_v29  ;;  %986 = vst.msk [vmem:[%s2545_s12 + $0x18] sm:$0xff] %vm120_vm0, %v942_v30 }
 0x33b   :  { %v948_v24 = vpop.permute.xlu0 %947  ;;  %v946_v32 = vpop.permute.xlu1 %945 }
 0x33c   :  { %989 = vst.msk [vmem:[%s2545_s12 + $0x30] sm:$0xff] %vm120_vm0, %v948_v24  ;;  %988 = vst.msk [vmem:[%s2545_s12 + $0x28] sm:$0xff] %vm120_vm0, %v946_v32 }
 0x33f   :  { %v952_v34 = vpop.permute.xlu0 %951  ;;  %v950_v35 = vpop.permute.xlu1 %949 }
 0x340   :  { %991 = vst.msk [vmem:[%s2545_s12 + $0x40] sm:$0xff] %vm120_vm0, %v952_v34  ;;  %990 = vst.msk [vmem:[%s2545_s12 + $0x38] sm:$0xff] %vm120_vm0, %v950_v35 }
 0x343   :  { %v956_v37 = vpop.permute.xlu0 %955  ;;  %v954_v39 = vpop.permute.xlu1 %953 }
 0x344   :  { %993 = vst.msk [vmem:[%s2545_s12 + $0x50] sm:$0xff] %vm120_vm0, %v956_v37  ;;  %992 = vst.msk [vmem:[%s2545_s12 + $0x48] sm:$0xff] %vm120_vm0, %v954_v39 }
 0x347   :  { %v960_v27 = vpop.permute.xlu0 %959  ;;  %v958_v19 = vpop.permute.xlu1 %957 }
 0x348   :  { %995 = vst.msk [vmem:[%s2545_s12 + $0x60] sm:$0xff] %vm120_vm0, %v960_v27  ;;  %994 = vst.msk [vmem:[%s2545_s12 + $0x58] sm:$0xff] %vm120_vm0, %v958_v19 }
 0x34b   :  { %v964_v45 = vpop.permute.xlu0 %963  ;;  %v962_v33 = vpop.permute.xlu1 %961 }
 0x34c   :  { %997 = vst.msk [vmem:[%s2545_s12 + $0x70] sm:$0xff] %vm120_vm0, %v964_v45  ;;  %996 = vst.msk [vmem:[%s2545_s12 + $0x68] sm:$0xff] %vm120_vm0, %v962_v33 }
 0x34f   :  { %v966_v46 = vpop.permute.xlu1 %965 }
 0x350   :  { %998 = vst.msk [vmem:[%s2545_s12 + $0x78] sm:$0xff] %vm120_vm0, %v966_v46 }
 0x3c9   :  { %v1544_v21 = vpop.f32.mrb[0].mxu1 }
 0x3ca   :  { %v1121_v31 = vadd.f32 %v1544_v21, %v2443_v11  ;;  %v1112_v40 = vpop.f32.mrb[1].mxu1 }
 0x3cb   :  { %v1113_v51 = vadd.f32 %v2443_v11, %v1112_v40  ;;  %v1545_v53 = vpop.f32.mrb[2].mxu1 }
 0x3cc   :  { %v1193_v43 = vmul.f32 0.01, %v1121_v31  ;;  %v1124_v48 = vadd.f32 %v1545_v53, %v2443_v11  ;;  %v1115_v55 = vpop.f32.mrb[3].mxu1  ;;  %vm1177_vm3 = vcmp.ge.f32.partialorder %v1121_v31, 0.0 }
 0x3cd   :  { %v1191_v57 = vmul.f32 0.01, %v1113_v51  ;;  %v1116_v36 = vadd.f32 %v2443_v11, %v1115_v55  ;;  %vm1175_vm4 = vcmp.ge.f32.partialorder %v1113_v51, 0.0 }
 0x3ce   :  { %vm1178_vm5 = vcmp.ge.f32.partialorder %v1124_v48, 0.0  ;;  %v1194_v41 = vmul.f32 0.01, %v1124_v48  ;;  %v1209_v54 = vsel %vm1177_vm3, %v1121_v31, %v1193_v43 }
 0x3cf   :  { %vm1176_vm6 = vcmp.ge.f32.partialorder %v1116_v36, 0.0  ;;  %v1192_v0 = vmul.f32 0.01, %v1116_v36  ;;  %v1207_v60 = vsel %vm1175_vm4, %v1113_v51, %v1191_v57  ;;  %vm1375_vm4 = vcmask 15360  }
 0x3d0   :  { %v1210_v56 = vsel %vm1178_vm5, %v1124_v48, %v1194_v41 }
 0x3d1   :  { %v1224_v61 = vpack.c.bf16 %v1210_v56, %v1209_v54  ;;  %v1208_v3 = vsel %vm1176_vm6, %v1116_v36, %v1192_v0  ;;  %v1548_v2 = vpop.f32.mrb[4].mxu1  ;;  %v1450_v36 = vld [vmem:[%s2547_s9] ss:$0 sm:$0xff] }
 0x3d2   :  { %v1223_v4 = vpack.c.bf16 %v1208_v3, %v1207_v60  ;;  %v1137_v52 = vadd.f32 %v1548_v2, %v2443_v11  ;;  %v1128_v1 = vpop.f32.mrb[5].mxu1 }
 0x3d3   :  { %v1129_v10 = vadd.f32 %v2443_v11, %v1128_v1  ;;  %v1549_v15 = vpop.f32.mrb[6].mxu1 }
 0x3d4   :  { %1562 = vmatprep.mubr.msk.bf16.mxu1 %vm120_vm0, %v1223_v4  ;;  %v1197_v17 = vmul.f32 0.01, %v1137_v52  ;;  %v1140_v22 = vadd.f32 %v1549_v15, %v2443_v11  ;;  %v1131_v47 = vpop.f32.mrb[7].mxu1  ;;  %vm1181_vm7 = vcmp.ge.f32.partialorder %v1137_v52, 0.0 }
 0x3d5   :  { %1563 = vmatmul.mubr.msk.bf16.vlgmr.msra.gmra.mrb[16].mxu1 %vm120_vm0, %v1224_v61  ;;  %v1195_v50 = vmul.f32 0.01, %v1129_v10  ;;  %v1132_v28 = vadd.f32 %v2443_v11, %v1131_v47  ;;  %vm1179_vm8 = vcmp.ge.f32.partialorder %v1129_v10, 0.0 }
 0x3d6   :  { %vm1182_vm9 = vcmp.ge.f32.partialorder %v1140_v22, 0.0  ;;  %v1198_v58 = vmul.f32 0.01, %v1140_v22  ;;  %v1213_v62 = vsel %vm1181_vm7, %v1137_v52, %v1197_v17 }
 0x3d7   :  { %vm1180_vm10 = vcmp.ge.f32.partialorder %v1132_v28, 0.0  ;;  %v1196_v59 = vmul.f32 0.01, %v1132_v28  ;;  %v1211_v9 = vsel %vm1179_vm8, %v1129_v10, %v1195_v50 }
 0x3d8   :  { %v1214_v6 = vsel %vm1182_vm9, %v1140_v22, %v1198_v58 }
 0x3d9   :  { %v1226_v20 = vpack.c.bf16 %v1214_v6, %v1213_v62  ;;  %v1212_v26 = vsel %vm1180_vm10, %v1132_v28, %v1196_v59  ;;  %v1552_v25 = vpop.f32.mrb[8].mxu1 }
 0x3da   :  { %v1225_v38 = vpack.c.bf16 %v1212_v26, %v1211_v9  ;;  %v1153_v49 = vadd.f32 %v1552_v25, %v2443_v11  ;;  %v1144_v42 = vpop.f32.mrb[9].mxu1 }
 0x3db   :  { %v1145_v63 = vadd.f32 %v2443_v11, %v1144_v42  ;;  %v1553_v44 = vpop.f32.mrb[10].mxu1 }
 0x3dc   :  { %1566 = vmatprep.mubr.msk.bf16.mxu1 %vm120_vm0, %v1225_v38  ;;  %v1201_v5 = vmul.f32 0.01, %v1153_v49  ;;  %v1156_v8 = vadd.f32 %v1553_v44, %v2443_v11  ;;  %v1147_v7 = vpop.f32.mrb[11].mxu1  ;;  %vm1185_vm11 = vcmp.ge.f32.partialorder %v1153_v49, 0.0 }
 0x3dd   :  { %1567 = vmatmul.mubr.msk.bf16.gmra.mrb[20].mxu1 %vm120_vm0, %v1226_v20  ;;  %v1199_v12 = vmul.f32 0.01, %v1145_v63  ;;  %v1148_v13 = vadd.f32 %v2443_v11, %v1147_v7  ;;  %vm1183_vm12 = vcmp.ge.f32.partialorder %v1145_v63, 0.0 }
 0x3de   :  { %vm1186_vm13 = vcmp.ge.f32.partialorder %v1156_v8, 0.0  ;;  %v1202_v14 = vmul.f32 0.01, %v1156_v8  ;;  %v1217_v18 = vsel %vm1185_vm11, %v1153_v49, %v1201_v5 }
 0x3df   :  { %vm1184_vm14 = vcmp.ge.f32.partialorder %v1148_v13, 0.0  ;;  %v1200_v16 = vmul.f32 0.01, %v1148_v13  ;;  %v1215_v29 = vsel %vm1183_vm12, %v1145_v63, %v1199_v12 }
 0x3e0   :  { %v1218_v23 = vsel %vm1186_vm13, %v1156_v8, %v1202_v14 }
 0x3e1   :  { %v1228_v30 = vpack.c.bf16 %v1218_v23, %v1217_v18  ;;  %v1216_v24 = vsel %vm1184_vm14, %v1148_v13, %v1200_v16 }
 0x3e2   :  { %v1227_v32 = vpack.c.bf16 %v1216_v24, %v1215_v29 }
 0x3e3   :  { %v1556_v34 = vpop.f32.mrb[12].mxu1 }
 0x3e4   :  { %v1169_v35 = vadd.f32 %v1556_v34, %v2443_v11  ;;  %v1160_v37 = vpop.f32.mrb[13].mxu1  ;;  %1570 = vmatprep.mubr.msk.bf16.mxu1 %vm120_vm0, %v1227_v32 }
 0x3e5   :  { %v1161_v39 = vadd.f32 %v2443_v11, %v1160_v37  ;;  %v1557_v27 = vpop.f32.mrb[14].mxu1  ;;  %1571 = vmatmul.mubr.msk.bf16.gmra.mrb[24].mxu1 %vm120_vm0, %v1228_v30 }
 0x3e6   :  { %v1205_v19 = vmul.f32 0.01, %v1169_v35  ;;  %v1172_v45 = vadd.f32 %v1557_v27, %v2443_v11  ;;  %v1163_v33 = vpop.f32.mrb[15].mxu1  ;;  %vm1189_vm15 = vcmp.ge.f32.partialorder %v1169_v35, 0.0 }
 0x3e7   :  { %v1203_v46 = vmul.f32 0.01, %v1161_v39  ;;  %v1164_v21 = vadd.f32 %v2443_v11, %v1163_v33  ;;  %vm1187_vm1 = vcmp.ge.f32.partialorder %v1161_v39, 0.0 }
 0x3e8   :  { %vm1190_vm2 = vcmp.ge.f32.partialorder %v1172_v45, 0.0  ;;  %v1206_v31 = vmul.f32 0.01, %v1172_v45  ;;  %v1221_v51 = vsel %vm1189_vm15, %v1169_v35, %v1205_v19 }
 0x3e9   :  { %vm1188_vm3 = vcmp.ge.f32.partialorder %v1164_v21, 0.0  ;;  %v1204_v40 = vmul.f32 0.01, %v1164_v21  ;;  %v1219_v43 = vsel %vm1187_vm1, %v1161_v39, %v1203_v46 }
 0x3ea   :  { %v1222_v53 = vsel %vm1190_vm2, %v1172_v45, %v1206_v31 }
 0x3eb   :  { %v1230_v48 = vpack.c.bf16 %v1222_v53, %v1221_v51  ;;  %v1220_v55 = vsel %vm1188_vm3, %v1164_v21, %v1204_v40 }
 0x3ec   :  { %v1229_v57 = vpack.c.bf16 %v1220_v55, %v1219_v43 }
 0x3ee   :  { %1574 = vmatprep.mubr.msk.bf16.mxu1 %vm120_vm0, %v1229_v57 }
 0x3ef   :  { %1575 = vmatmul.mubr.msk.bf16.gmra.mrb[28].mxu1 %vm120_vm0, %v1230_v48 }
 0x4a8   :  { %v1564_v11 = vpop.f32.mrb[16].mxu1 }
 0x4a9   :  { %v1321_v41 = vadd.f32 %v1564_v11, %v1450_v36  ;;  %v1312_v0 = vpop.f32.mrb[17].mxu1 }
 0x4aa   :  { %v1313_v54 = vadd.f32 %v1450_v36, %v1312_v0  ;;  %v1565_v56 = vpop.f32.mrb[18].mxu1 }
 0x4ab   :  { %1378 = vst.msk [vmem:[%s2548_s10 + $0x10] sm:$0xff] %vm1375_vm4, %v1321_v41  ;;  %v1324_v60 = vadd.f32 %v1565_v56, %v1450_v36  ;;  %v1315_v61 = vpop.f32.mrb[19].mxu1 }
 0x4ac   :  { %1376 = vst.msk [vmem:[%s2548_s10] sm:$0xff] %vm1375_vm4, %v1313_v54  ;;  %v1316_v3 = vadd.f32 %v1450_v36, %v1315_v61 }
 0x4ad   :  { %1379 = vst.msk [vmem:[%s2548_s10 + $0x18] sm:$0xff] %vm1375_vm4, %v1324_v60 }
 0x4ae   :  { %1377 = vst.msk [vmem:[%s2548_s10 + $0x8] sm:$0xff] %vm1375_vm4, %v1316_v3 }
 0x4b0   :  { %v1568_v4 = vpop.f32.mrb[20].mxu1 }
 0x4b1   :  { %v1337_v2 = vadd.f32 %v1568_v4, %v1450_v36  ;;  %v1328_v52 = vpop.f32.mrb[21].mxu1 }
 0x4b2   :  { %v1329_v1 = vadd.f32 %v1450_v36, %v1328_v52  ;;  %v1569_v10 = vpop.f32.mrb[22].mxu1 }
 0x4b3   :  { %1382 = vst.msk [vmem:[%s2548_s10 + $0x30] sm:$0xff] %vm1375_vm4, %v1337_v2  ;;  %v1340_v15 = vadd.f32 %v1569_v10, %v1450_v36  ;;  %v1331_v17 = vpop.f32.mrb[23].mxu1 }
 0x4b4   :  { %1380 = vst.msk [vmem:[%s2548_s10 + $0x20] sm:$0xff] %vm1375_vm4, %v1329_v1  ;;  %v1332_v22 = vadd.f32 %v1450_v36, %v1331_v17 }
 0x4b5   :  { %1383 = vst.msk [vmem:[%s2548_s10 + $0x38] sm:$0xff] %vm1375_vm4, %v1340_v15 }
 0x4b6   :  { %1381 = vst.msk [vmem:[%s2548_s10 + $0x28] sm:$0xff] %vm1375_vm4, %v1332_v22 }
 0x4b8   :  { %v1572_v47 = vpop.f32.mrb[24].mxu1 }
 0x4b9   :  { %v1353_v50 = vadd.f32 %v1572_v47, %v1450_v36  ;;  %v1344_v28 = vpop.f32.mrb[25].mxu1 }
 0x4ba   :  { %v1345_v58 = vadd.f32 %v1450_v36, %v1344_v28  ;;  %v1573_v59 = vpop.f32.mrb[26].mxu1 }
 0x4bb   :  { %1386 = vst.msk [vmem:[%s2548_s10 + $0x50] sm:$0xff] %vm1375_vm4, %v1353_v50  ;;  %v1356_v62 = vadd.f32 %v1573_v59, %v1450_v36  ;;  %v1347_v6 = vpop.f32.mrb[27].mxu1 }
 0x4bc   :  { %1384 = vst.msk [vmem:[%s2548_s10 + $0x40] sm:$0xff] %vm1375_vm4, %v1345_v58  ;;  %v1348_v9 = vadd.f32 %v1450_v36, %v1347_v6 }
 0x4bd   :  { %1387 = vst.msk [vmem:[%s2548_s10 + $0x58] sm:$0xff] %vm1375_vm4, %v1356_v62 }
 0x4be   :  { %1385 = vst.msk [vmem:[%s2548_s10 + $0x48] sm:$0xff] %vm1375_vm4, %v1348_v9 }
 0x4c2   :  { %v1576_v20 = vpop.f32.mrb[28].mxu1 }
 0x4c3   :  { %v1369_v26 = vadd.f32 %v1576_v20, %v1450_v36  ;;  %v1360_v38 = vpop.f32.mrb[29].mxu1 }
 0x4c4   :  { %v1361_v25 = vadd.f32 %v1450_v36, %v1360_v38  ;;  %v1577_v49 = vpop.f32.mrb[30].mxu1 }
 0x4c5   :  { %1390 = vst.msk [vmem:[%s2548_s10 + $0x70] sm:$0xff] %vm1375_vm4, %v1369_v26  ;;  %v1372_v42 = vadd.f32 %v1577_v49, %v1450_v36  ;;  %v1363_v63 = vpop.f32.mrb[31].mxu1 }
 0x4c6   :  { %1388 = vst.msk [vmem:[%s2548_s10 + $0x60] sm:$0xff] %vm1375_vm4, %v1361_v25  ;;  %v1364_v44 = vadd.f32 %v1450_v36, %v1363_v63 }
 0x4c7   :  { %1391 = vst.msk [vmem:[%s2548_s10 + $0x78] sm:$0xff] %vm1375_vm4, %v1372_v42 }
 0x4c8   :  { %1389 = vst.msk [vmem:[%s2548_s10 + $0x68] sm:$0xff] %vm1375_vm4, %v1364_v44 }

</bundles_post_ra>
